<compile_context>
chip_gen: v7x
topology: tpu7x:2x2x1
jax: 0.10.0
libtpu: 0.0.40
codegen_flags: <defaults>
</compile_context>

<pallas_src>
import functools

import jax
import jax.numpy as jnp
from jax.experimental import pallas as pl
from jax.experimental.pallas import tpu as pltpu

# ------------------------- small, lane-dense "roberta-base"-shaped config ----------------------
VOCAB = 64
HIDDEN = 128                 # multiple of 128 -> lane-dense output block & matmul operands
N_HEADS = 2
HEAD_DIM = HIDDEN // N_HEADS  # 64, same head_dim as real roberta-base
N_LAYERS = 2
INTERMEDIATE = 512           # 4 * HIDDEN, multiple of 128
MAX_POS = 40
PAD_ID = 1                   # RoBERTa padding_idx
TYPE_VOCAB = 1
LN_EPS = 1e-5


# --------------------------------------- in-kernel helpers ------------------------------------
def _layernorm(x, g, b):
    mu = jnp.mean(x, axis=-1, keepdims=True)
    var = jnp.mean(jnp.square(x - mu), axis=-1, keepdims=True)
    return (x - mu) * jax.lax.rsqrt(var + LN_EPS) * g + b


# --------------------------------------- fused encoder kernel ---------------------------------
def _encoder_kernel(emb_ref, bias_ref, emb_g_ref, emb_b_ref,
                    wqkv_ref, bqkv_ref, wo_ref, bo_ref,
                    ln1_g_ref, ln1_b_ref, w1_ref, b1_ref,
                    w2_ref, b2_ref, ln2_g_ref, ln2_b_ref,
                    h_ref, ctx_ref, *, seq):
    """One grid step == (one sequence, one encoder layer).

    Grid = (batch, layer).  The output block h_ref (S, H) is resident in VMEM across the
    trailing layer axis and carries the hidden state from layer to layer; ctx_ref is a VMEM
    scratch used to assemble the per-head attention outputs without any concatenates."""

    # ---- layer 0: embedding LayerNorm (no residual, no zeros tensor) ----
    @pl.when(pl.program_id(1) == 0)
    def _init():
        h_ref[...] = _layernorm(emb_ref[...], emb_g_ref[...], emb_b_ref[...])

    h = h_ref[...]                                                    # (S, H) f32

    # ---- fused QKV projection: single MXU pass, bf16 inputs, f32 accumulate ----
    qkv = jnp.dot(h.astype(jnp.bfloat16), wqkv_ref[0],
                  preferred_element_type=jnp.float32) + bqkv_ref[0]   # (S, 3H) f32

    scale = jnp.float32(1.0 / float(HEAD_DIM) ** 0.5)
    key_bias = bias_ref[0]                                            # (1, S) f32, precomputed

    # ---- attention: short head loop, PV results written straight into VMEM scratch ----
    for hh in range(N_HEADS):
        c0 = hh * HEAD_DIM
        # scale folded into q (S, D) instead of scaling the (S, S) score matrix
        q = (qkv[:, c0:c0 + HEAD_DIM] * scale).astype(jnp.bfloat16)
        k = qkv[:, HIDDEN + c0:HIDDEN + c0 + HEAD_DIM].astype(jnp.bfloat16)
        v = qkv[:, 2 * HIDDEN + c0:2 * HIDDEN + c0 + HEAD_DIM].astype(jnp.bfloat16)

        s = jax.lax.dot_general(q, k, (((1,), (1,)), ((), ())),       # q @ k^T
                                preferred_element_type=jnp.float32) + key_bias   # (S, S)
        m = jnp.max(s, axis=-1, keepdims=True)
        p = jnp.exp(s - m)
        denom = jnp.sum(p, axis=-1, keepdims=True)                    # (S, 1)

        head_ctx = jnp.dot(p.astype(jnp.bfloat16), v,
                           preferred_element_type=jnp.float32)        # (S, D)
        # deferred softmax normalization on the (S, D) context, exact reciprocal
        head_ctx = head_ctx * pl.reciprocal(denom, approx=False)
        ctx_ref[:, c0:c0 + HEAD_DIM] = head_ctx                        # no concat

    ctx = ctx_ref[...]                                                # (S, H) f32

    # ---- attention output projection + residual + LayerNorm ----
    attn = jnp.dot(ctx.astype(jnp.bfloat16), wo_ref[0],
                   preferred_element_type=jnp.float32) + bo_ref[0]
    h1 = _layernorm(attn + h, ln1_g_ref[0], ln1_b_ref[0])

    # ---- FFN: dense -> GELU -> dense, + residual + LayerNorm ----
    ff = jnp.dot(h1.astype(jnp.bfloat16), w1_ref[0],
                 preferred_element_type=jnp.float32) + b1_ref[0]
    c = jnp.float32(0.7978845608028654)  # sqrt(2/pi); tanh-GELU (see TODO above)
    ff = 0.5 * ff * (1.0 + jnp.tanh(c * (ff + 0.044715 * ff * ff * ff)))
    ff2 = jnp.dot(ff.astype(jnp.bfloat16), w2_ref[0],
                  preferred_element_type=jnp.float32) + b2_ref[0]
    h_ref[...] = _layernorm(ff2 + h1, ln2_g_ref[0], ln2_b_ref[0]).astype(h_ref.dtype)


# --------------------------------------- kernel wrapper ---------------------------------------
def _encoder_stack(emb, key_bias, p, batch, seq):
    h = HIDDEN
    per_seq2 = lambda b, l: (b, 0)          # per-sequence block, resident across layers
    per_seq3 = lambda b, l: (b, 0, 0)
    const2 = lambda b, l: (0, 0)            # constant block (DMA'd once, never re-fetched)
    per_layer = lambda b, l: (l, 0, 0)      # per-layer slice of stacked weights (prefetched)

    in_specs = [
        pl.BlockSpec((seq, h), per_seq2),                  # emb (B*S, H) -> (S, H) block
        pl.BlockSpec((1, 1, seq), per_seq3),               # additive key bias (B, 1, S) f32
        pl.BlockSpec((1, h), const2),                      # emb_ln gamma
        pl.BlockSpec((1, h), const2),                      # emb_ln beta
        pl.BlockSpec((1, h, 3 * h), per_layer),            # wqkv  (bf16)
        pl.BlockSpec((1, 1, 3 * h), per_layer),            # bqkv
        pl.BlockSpec((1, h, h), per_layer),                # wo    (bf16)
        pl.BlockSpec((1, 1, h), per_layer),                # bo
        pl.BlockSpec((1, 1, h), per_layer),                # ln1 gamma
        pl.BlockSpec((1, 1, h), per_layer),                # ln1 beta
        pl.BlockSpec((1, h, INTERMEDIATE), per_layer),     # w1    (bf16)
        pl.BlockSpec((1, 1, INTERMEDIATE), per_layer),     # b1
        pl.BlockSpec((1, INTERMEDIATE, h), per_layer),     # w2    (bf16)
        pl.BlockSpec((1, 1, h), per_layer),                # b2
        pl.BlockSpec((1, 1, h), per_layer),                # ln2 gamma
        pl.BlockSpec((1, 1, h), per_layer),                # ln2 beta
    ]

    return pl.pallas_call(
        functools.partial(_encoder_kernel, seq=seq),
        out_shape=jax.ShapeDtypeStruct((batch * seq, h), jnp.float32),
        grid=(batch, N_LAYERS),
        in_specs=in_specs,
        out_specs=pl.BlockSpec((seq, h), per_seq2),
        scratch_shapes=[pltpu.VMEM((seq, h), jnp.float32)],   # per-head ctx assembly buffer
        compiler_params=pltpu.CompilerParams(
            # sequences are independent -> "parallel" (2 TCs on v7x); layers are sequential.
            dimension_semantics=("parallel", "arbitrary"),
            vmem_limit_bytes=64 * 1024 * 1024),
    )(emb, key_bias, p["emb_ln_g"], p["emb_ln_b"],
      p["wqkv"], p["bqkv"], p["wo"], p["bo"],
      p["ln1_g"], p["ln1_b"], p["w1"], p["b1"],
      p["w2"], p["b2"], p["ln2_g"], p["ln2_b"])


# ---------------------------------------- model forward ---------------------------------------
def roberta_forward(params, input_ids, attention_mask):
    B, S = input_ids.shape

    # --- embeddings (gather glue, plain JAX) ---
    not_pad = (input_ids != PAD_ID).astype(jnp.int32)
    # RoBERTa-style position ids: cumsum over non-pad tokens + padding_idx
    position_ids = jnp.cumsum(not_pad, axis=1) * not_pad + PAD_ID
    we = jnp.take(params["word_emb"], input_ids, axis=0)
    pe = jnp.take(params["pos_emb"], position_ids, axis=0)
    te = jnp.take(params["type_emb"], jnp.zeros_like(input_ids), axis=0)
    emb = (we + pe + te).astype(jnp.float32).reshape(B * S, HIDDEN)

    # additive key bias built ONCE here (0 for real tokens, -1e9 for pad), (B, 1, S) f32
    key_bias = ((1.0 - attention_mask.astype(jnp.float32)) * jnp.float32(-1e9)).reshape(B, 1, S)

    h = _encoder_stack(emb, key_bias, params, B, S)          # (B*S, H)
    return h.reshape(B, S, HIDDEN)[:, 0]                     # h_cls


# --------------------------------------- parameter init ---------------------------------------
def init_params(key):
    std = 0.02

    def nrm(k, shape):
        return jax.random.normal(k, shape, dtype=jnp.float32) * std

    keys = iter(jax.random.split(key, 3 + N_LAYERS * 6))
    params = {
        "word_emb": nrm(next(keys), (VOCAB, HIDDEN)),
        "pos_emb": nrm(next(keys), (MAX_POS, HIDDEN)),
        "type_emb": nrm(next(keys), (TYPE_VOCAB, HIDDEN)),
        "emb_ln_g": jnp.ones((1, HIDDEN), jnp.float32),
        "emb_ln_b": jnp.zeros((1, HIDDEN), jnp.float32),
    }

    wqkv, wo, w1, w2 = [], [], [], []
    for _ in range(N_LAYERS):
        wq = nrm(next(keys), (HIDDEN, HIDDEN))
        wk = nrm(next(keys), (HIDDEN, HIDDEN))
        wv = nrm(next(keys), (HIDDEN, HIDDEN))
        wqkv.append(jnp.concatenate([wq, wk, wv], axis=1))         # (H, 3H)
        wo.append(nrm(next(keys), (HIDDEN, HIDDEN)))
        w1.append(nrm(next(keys), (HIDDEN, INTERMEDIATE)))
        w2.append(nrm(next(keys), (INTERMEDIATE, HIDDEN)))

    # weights stored bf16 (MXU inputs); biases / LayerNorm params stay fp32
    params.update({
        "wqkv": jnp.stack(wqkv).astype(jnp.bfloat16),              # (L, H, 3H)
        "bqkv": jnp.zeros((N_LAYERS, 1, 3 * HIDDEN), jnp.float32),
        "wo":   jnp.stack(wo).astype(jnp.bfloat16),                # (L, H, H)
        "bo":   jnp.zeros((N_LAYERS, 1, HIDDEN), jnp.float32),
        "ln1_g": jnp.ones((N_LAYERS, 1, HIDDEN), jnp.float32),
        "ln1_b": jnp.zeros((N_LAYERS, 1, HIDDEN), jnp.float32),
        "w1":   jnp.stack(w1).astype(jnp.bfloat16),                # (L, H, I)
        "b1":   jnp.zeros((N_LAYERS, 1, INTERMEDIATE), jnp.float32),
        "w2":   jnp.stack(w2).astype(jnp.bfloat16),                # (L, I, H)
        "b2":   jnp.zeros((N_LAYERS, 1, HIDDEN), jnp.float32),
        "ln2_g": jnp.ones((N_LAYERS, 1, HIDDEN), jnp.float32),
        "ln2_b": jnp.zeros((N_LAYERS, 1, HIDDEN), jnp.float32),
    })
    return params


# --------------------------------------------- main -------------------------------------------
if __name__ == "__main__":
    key = jax.random.PRNGKey(0)
    pkey, dkey = jax.random.split(key)
    params = init_params(pkey)

    B, S = 2, 8
    input_ids = jax.random.randint(dkey, (B, S), 2, VOCAB, dtype=jnp.int32)
    input_ids = input_ids.at[1, -2:].set(PAD_ID)          # some padding in the second sequence
    attention_mask = (input_ids != PAD_ID).astype(jnp.int32)

    fwd = jax.jit(roberta_forward)
    h_cls = fwd(params, input_ids, attention_mask)
    h_cls = jax.block_until_ready(h_cls)

    assert h_cls.shape == (B, HIDDEN) and h_cls.dtype == jnp.float32
    assert bool(jnp.all(jnp.isfinite(h_cls)))
    print("KERNEL_OK")
</pallas_src>

<mosaic_0001>
module attributes {stable_mosaic.version = 11 : i64} {
  func.func @_encoder_kernel(%arg0: i32, %arg1: i32, %arg2: memref<8x128xf32, #tpu.memory_space<vmem>>, %arg3: memref<1x1x8xf32, #tpu.memory_space<vmem>>, %arg4: memref<1x128xf32, #tpu.memory_space<vmem>>, %arg5: memref<1x128xf32, #tpu.memory_space<vmem>>, %arg6: memref<1x128x384xbf16, #tpu.memory_space<vmem>>, %arg7: memref<1x1x384xf32, #tpu.memory_space<vmem>>, %arg8: memref<1x128x128xbf16, #tpu.memory_space<vmem>>, %arg9: memref<1x1x128xf32, #tpu.memory_space<vmem>>, %arg10: memref<1x1x128xf32, #tpu.memory_space<vmem>>, %arg11: memref<1x1x128xf32, #tpu.memory_space<vmem>>, %arg12: memref<1x128x512xbf16, #tpu.memory_space<vmem>>, %arg13: memref<1x1x512xf32, #tpu.memory_space<vmem>>, %arg14: memref<1x512x128xbf16, #tpu.memory_space<vmem>>, %arg15: memref<1x1x128xf32, #tpu.memory_space<vmem>>, %arg16: memref<1x1x128xf32, #tpu.memory_space<vmem>>, %arg17: memref<1x1x128xf32, #tpu.memory_space<vmem>>, %arg18: memref<8x128xf32, #tpu.memory_space<vmem>>, %arg19: memref<8x128xf32, #tpu.memory_space<vmem>>) attributes {dimension_semantics = [#tpu.dimension_semantics<parallel>, #tpu.dimension_semantics<arbitrary>], iteration_bounds = array<i64: 2, 2>, scalar_prefetch = 0 : i64, scratch_operands = 1 : i64, tpu.core_type = #tpu.core_type<tc>, window_params = [{transform_indices = @transform_0, window_bounds = array<i64: 8, 128>}, {transform_indices = @transform_1, window_bounds = array<i64: 1, 1, 8>}, {pipeline_mode = #tpu.pipeline_mode<synchronous>, transform_indices = @transform_2, window_bounds = array<i64: 1, 128>}, {pipeline_mode = #tpu.pipeline_mode<synchronous>, transform_indices = @transform_3, window_bounds = array<i64: 1, 128>}, {transform_indices = @transform_4, window_bounds = array<i64: 1, 128, 384>}, {transform_indices = @transform_5, window_bounds = array<i64: 1, 1, 384>}, {transform_indices = @transform_6, window_bounds = array<i64: 1, 128, 128>}, {transform_indices = @transform_7, window_bounds = array<i64: 1, 1, 128>}, {transform_indices = @transform_8, window_bounds = array<i64: 1, 1, 128>}, {transform_indices = @transform_9, window_bounds = array<i64: 1, 1, 128>}, {transform_indices = @transform_10, window_bounds = array<i64: 1, 128, 512>}, {transform_indices = @transform_11, window_bounds = array<i64: 1, 1, 512>}, {transform_indices = @transform_12, window_bounds = array<i64: 1, 512, 128>}, {transform_indices = @transform_13, window_bounds = array<i64: 1, 1, 128>}, {transform_indices = @transform_14, window_bounds = array<i64: 1, 1, 128>}, {transform_indices = @transform_15, window_bounds = array<i64: 1, 1, 128>}, {transform_indices = @transform_16, window_bounds = array<i64: 8, 128>}]} {
    %c0_i32 = arith.constant 0 : i32
    %0 = arith.cmpi eq, %arg1, %c0_i32 : i32
    %1 = arith.extui %0 : i1 to i32
    %c0_i32_0 = arith.constant 0 : i32
    %2 = arith.cmpi ne, %1, %c0_i32_0 : i32
    scf.if %2 {
      %c0_75 = arith.constant 0 : index
      %c0_76 = arith.constant 0 : index
      %155 = vector.load %arg2[%c0_75, %c0_76] : memref<8x128xf32, #tpu.memory_space<vmem>>, vector<8x128xf32>
      %c0_77 = arith.constant 0 : index
      %c0_78 = arith.constant 0 : index
      %156 = vector.load %arg4[%c0_77, %c0_78] : memref<1x128xf32, #tpu.memory_space<vmem>>, vector<1x128xf32>
      %c0_79 = arith.constant 0 : index
      %c0_80 = arith.constant 0 : index
      %157 = vector.load %arg5[%c0_79, %c0_80] : memref<1x128xf32, #tpu.memory_space<vmem>>, vector<1x128xf32>
      %cst_81 = arith.constant dense<0.000000e+00> : vector<8xf32>
      %158 = vector.multi_reduction <add>, %155, %cst_81 [1] : vector<8x128xf32> to vector<8xf32>
      %159 = vector.shape_cast %158 : vector<8xf32> to vector<8x1xf32>
      %cst_82 = arith.constant 1.280000e+02 : f32
      %160 = vector.broadcast %cst_82 : f32 to vector<8x1xf32>
      %161 = arith.divf %159, %160 : vector<8x1xf32>
      %162 = vector.broadcast %161 : vector<8x1xf32> to vector<8x128xf32>
      %163 = arith.subf %155, %162 : vector<8x128xf32>
      %164 = arith.mulf %163, %163 : vector<8x128xf32>
      %cst_83 = arith.constant dense<0.000000e+00> : vector<8xf32>
      %165 = vector.multi_reduction <add>, %164, %cst_83 [1] : vector<8x128xf32> to vector<8xf32>
      %166 = vector.shape_cast %165 : vector<8xf32> to vector<8x1xf32>
      %cst_84 = arith.constant 1.280000e+02 : f32
      %167 = vector.broadcast %cst_84 : f32 to vector<8x1xf32>
      %168 = arith.divf %166, %167 : vector<8x1xf32>
      %169 = vector.broadcast %161 : vector<8x1xf32> to vector<8x128xf32>
      %170 = arith.subf %155, %169 : vector<8x128xf32>
      %cst_85 = arith.constant 9.99999974E-6 : f32
      %171 = vector.broadcast %cst_85 : f32 to vector<8x1xf32>
      %172 = arith.addf %168, %171 : vector<8x1xf32>
      %173 = math.rsqrt %172 : vector<8x1xf32>
      %174 = vector.broadcast %173 : vector<8x1xf32> to vector<8x128xf32>
      %175 = arith.mulf %170, %174 : vector<8x128xf32>
      %176 = vector.broadcast %156 : vector<1x128xf32> to vector<8x128xf32>
      %177 = arith.mulf %175, %176 : vector<8x128xf32>
      %178 = vector.broadcast %157 : vector<1x128xf32> to vector<8x128xf32>
      %179 = arith.addf %177, %178 : vector<8x128xf32>
      %c0_86 = arith.constant 0 : index
      %c0_87 = arith.constant 0 : index
      %180 = vector.load %arg18[%c0_86, %c0_87] : memref<8x128xf32, #tpu.memory_space<vmem>>, vector<8x128xf32>
      tpu.vector_store %arg18[%c0_86, %c0_87], %179 {strides = array<i32>} : memref<8x128xf32, #tpu.memory_space<vmem>>, vector<8x128xf32>,
    } else {
    }
    %c0 = arith.constant 0 : index
    %c0_1 = arith.constant 0 : index
    %3 = vector.load %arg18[%c0, %c0_1] : memref<8x128xf32, #tpu.memory_space<vmem>>, vector<8x128xf32>
    %4 = arith.truncf %3 : vector<8x128xf32> to vector<8x128xbf16>
    %c0_2 = arith.constant 0 : index
    %c0_3 = arith.constant 0 : index
    %c0_4 = arith.constant 0 : index
    %5 = vector.load %arg6[%c0_2, %c0_3, %c0_4] : memref<1x128x384xbf16, #tpu.memory_space<vmem>>, vector<1x128x384xbf16>
    %6 = vector.shape_cast %5 : vector<1x128x384xbf16> to vector<128x384xbf16>
    %cst = arith.constant dense<0.000000e+00> : vector<8x384xf32>
    %7 = tpu.matmul %4, %6, %cst {dimension_numbers = #tpu.dot_dimension_numbers<[1], [0], [0], [1], [0, 0, 1, 1], [], []>} : vector<8x128xbf16>, vector<128x384xbf16>, vector<8x384xf32> -> vector<8x384xf32>
    %c0_5 = arith.constant 0 : index
    %c0_6 = arith.constant 0 : index
    %c0_7 = arith.constant 0 : index
    %8 = vector.load %arg7[%c0_5, %c0_6, %c0_7] : memref<1x1x384xf32, #tpu.memory_space<vmem>>, vector<1x1x384xf32>
    %9 = vector.shape_cast %8 : vector<1x1x384xf32> to vector<1x384xf32>
    %10 = vector.broadcast %9 : vector<1x384xf32> to vector<8x384xf32>
    %11 = arith.addf %7, %10 : vector<8x384xf32>
    %c0_8 = arith.constant 0 : index
    %c0_9 = arith.constant 0 : index
    %c0_10 = arith.constant 0 : index
    %12 = vector.load %arg3[%c0_8, %c0_9, %c0_10] : memref<1x1x8xf32, #tpu.memory_space<vmem>>, vector<1x1x8xf32>
    %13 = vector.shape_cast %12 : vector<1x1x8xf32> to vector<1x8xf32>
    %14 = vector.extract_strided_slice %11 {offsets = [0, 0], sizes = [8, 64], strides = [1, 1]} : vector<8x384xf32> to vector<8x64xf32>
    %cst_11 = arith.constant 1.250000e-01 : f32
    %15 = vector.broadcast %cst_11 : f32 to vector<8x64xf32>
    %16 = arith.mulf %14, %15 : vector<8x64xf32>
    %17 = arith.truncf %16 : vector<8x64xf32> to vector<8x64xbf16>
    %18 = vector.extract_strided_slice %11 {offsets = [0, 128], sizes = [8, 64], strides = [1, 1]} : vector<8x384xf32> to vector<8x64xf32>
    %19 = arith.truncf %18 : vector<8x64xf32> to vector<8x64xbf16>
    %20 = vector.extract_strided_slice %11 {offsets = [0, 256], sizes = [8, 64], strides = [1, 1]} : vector<8x384xf32> to vector<8x64xf32>
    %21 = arith.truncf %20 : vector<8x64xf32> to vector<8x64xbf16>
    %cst_12 = arith.constant dense<0.000000e+00> : vector<8x8xf32>
    %22 = tpu.matmul %17, %19, %cst_12 {dimension_numbers = #tpu.dot_dimension_numbers<[1], [1], [0], [0], [0, 0, 1, 0], [], []>} : vector<8x64xbf16>, vector<8x64xbf16>, vector<8x8xf32> -> vector<8x8xf32>
    %23 = vector.broadcast %13 : vector<1x8xf32> to vector<8x8xf32>
    %24 = arith.addf %22, %23 : vector<8x8xf32>
    %cst_13 = arith.constant dense<0xFF800000> : vector<8xf32>
    %25 = vector.multi_reduction <maximumf>, %24, %cst_13 [1] : vector<8x8xf32> to vector<8xf32>
    %26 = vector.shape_cast %25 : vector<8xf32> to vector<8x1xf32>
    %27 = vector.broadcast %26 : vector<8x1xf32> to vector<8x8xf32>
    %28 = arith.subf %24, %27 : vector<8x8xf32>
    %29 = math.exp %28 : vector<8x8xf32>
    %cst_14 = arith.constant dense<0.000000e+00> : vector<8xf32>
    %30 = vector.multi_reduction <add>, %29, %cst_14 [1] : vector<8x8xf32> to vector<8xf32>
    %31 = vector.shape_cast %30 : vector<8xf32> to vector<8x1xf32>
    %32 = arith.truncf %29 : vector<8x8xf32> to vector<8x8xbf16>
    %cst_15 = arith.constant dense<0.000000e+00> : vector<8x64xf32>
    %33 = tpu.matmul %32, %21, %cst_15 {dimension_numbers = #tpu.dot_dimension_numbers<[1], [0], [0], [1], [0, 0, 1, 1], [], []>} : vector<8x8xbf16>, vector<8x64xbf16>, vector<8x64xf32> -> vector<8x64xf32>
    %34 = tpu.reciprocal %31 : vector<8x1xf32> -> vector<8x1xf32>
    %35 = vector.broadcast %34 : vector<8x1xf32> to vector<8x64xf32>
    %36 = arith.mulf %33, %35 : vector<8x64xf32>
    %c0_16 = arith.constant 0 : index
    %c0_17 = arith.constant 0 : index
    %37 = vector.load %arg19[%c0_16, %c0_17] : memref<8x128xf32, #tpu.memory_space<vmem>>, vector<8x64xf32>
    tpu.vector_store %arg19[%c0_16, %c0_17], %36 {strides = array<i32>} : memref<8x128xf32, #tpu.memory_space<vmem>>, vector<8x64xf32>,
    %38 = vector.extract_strided_slice %11 {offsets = [0, 64], sizes = [8, 64], strides = [1, 1]} : vector<8x384xf32> to vector<8x64xf32>
    %cst_18 = arith.constant 1.250000e-01 : f32
    %39 = vector.broadcast %cst_18 : f32 to vector<8x64xf32>
    %40 = arith.mulf %38, %39 : vector<8x64xf32>
    %41 = arith.truncf %40 : vector<8x64xf32> to vector<8x64xbf16>
    %42 = vector.extract_strided_slice %11 {offsets = [0, 192], sizes = [8, 64], strides = [1, 1]} : vector<8x384xf32> to vector<8x64xf32>
    %43 = arith.truncf %42 : vector<8x64xf32> to vector<8x64xbf16>
    %44 = vector.extract_strided_slice %11 {offsets = [0, 320], sizes = [8, 64], strides = [1, 1]} : vector<8x384xf32> to vector<8x64xf32>
    %45 = arith.truncf %44 : vector<8x64xf32> to vector<8x64xbf16>
    %cst_19 = arith.constant dense<0.000000e+00> : vector<8x8xf32>
    %46 = tpu.matmul %41, %43, %cst_19 {dimension_numbers = #tpu.dot_dimension_numbers<[1], [1], [0], [0], [0, 0, 1, 0], [], []>} : vector<8x64xbf16>, vector<8x64xbf16>, vector<8x8xf32> -> vector<8x8xf32>
    %47 = vector.broadcast %13 : vector<1x8xf32> to vector<8x8xf32>
    %48 = arith.addf %46, %47 : vector<8x8xf32>
    %cst_20 = arith.constant dense<0xFF800000> : vector<8xf32>
    %49 = vector.multi_reduction <maximumf>, %48, %cst_20 [1] : vector<8x8xf32> to vector<8xf32>
    %50 = vector.shape_cast %49 : vector<8xf32> to vector<8x1xf32>
    %51 = vector.broadcast %50 : vector<8x1xf32> to vector<8x8xf32>
    %52 = arith.subf %48, %51 : vector<8x8xf32>
    %53 = math.exp %52 : vector<8x8xf32>
    %cst_21 = arith.constant dense<0.000000e+00> : vector<8xf32>
    %54 = vector.multi_reduction <add>, %53, %cst_21 [1] : vector<8x8xf32> to vector<8xf32>
    %55 = vector.shape_cast %54 : vector<8xf32> to vector<8x1xf32>
    %56 = arith.truncf %53 : vector<8x8xf32> to vector<8x8xbf16>
    %cst_22 = arith.constant dense<0.000000e+00> : vector<8x64xf32>
    %57 = tpu.matmul %56, %45, %cst_22 {dimension_numbers = #tpu.dot_dimension_numbers<[1], [0], [0], [1], [0, 0, 1, 1], [], []>} : vector<8x8xbf16>, vector<8x64xbf16>, vector<8x64xf32> -> vector<8x64xf32>
    %58 = tpu.reciprocal %55 : vector<8x1xf32> -> vector<8x1xf32>
    %59 = vector.broadcast %58 : vector<8x1xf32> to vector<8x64xf32>
    %60 = arith.mulf %57, %59 : vector<8x64xf32>
    %c0_23 = arith.constant 0 : index
    %c64 = arith.constant 64 : index
    %61 = vector.load %arg19[%c0_23, %c64] : memref<8x128xf32, #tpu.memory_space<vmem>>, vector<8x64xf32>
    tpu.vector_store %arg19[%c0_23, %c64], %60 {strides = array<i32>} : memref<8x128xf32, #tpu.memory_space<vmem>>, vector<8x64xf32>,
    %c0_24 = arith.constant 0 : index
    %c0_25 = arith.constant 0 : index
    %62 = vector.load %arg19[%c0_24, %c0_25] : memref<8x128xf32, #tpu.memory_space<vmem>>, vector<8x128xf32>
    %63 = arith.truncf %62 : vector<8x128xf32> to vector<8x128xbf16>
    %c0_26 = arith.constant 0 : index
    %c0_27 = arith.constant 0 : index
    %c0_28 = arith.constant 0 : index
    %64 = vector.load %arg8[%c0_26, %c0_27, %c0_28] : memref<1x128x128xbf16, #tpu.memory_space<vmem>>, vector<1x128x128xbf16>
    %65 = vector.shape_cast %64 : vector<1x128x128xbf16> to vector<128x128xbf16>
    %cst_29 = arith.constant dense<0.000000e+00> : vector<8x128xf32>
    %66 = tpu.matmul %63, %65, %cst_29 {dimension_numbers = #tpu.dot_dimension_numbers<[1], [0], [0], [1], [0, 0, 1, 1], [], []>} : vector<8x128xbf16>, vector<128x128xbf16>, vector<8x128xf32> -> vector<8x128xf32>
    %c0_30 = arith.constant 0 : index
    %c0_31 = arith.constant 0 : index
    %c0_32 = arith.constant 0 : index
    %67 = vector.load %arg9[%c0_30, %c0_31, %c0_32] : memref<1x1x128xf32, #tpu.memory_space<vmem>>, vector<1x1x128xf32>
    %68 = vector.shape_cast %67 : vector<1x1x128xf32> to vector<1x128xf32>
    %69 = vector.broadcast %68 : vector<1x128xf32> to vector<8x128xf32>
    %70 = arith.addf %66, %69 : vector<8x128xf32>
    %71 = arith.addf %70, %3 : vector<8x128xf32>
    %c0_33 = arith.constant 0 : index
    %c0_34 = arith.constant 0 : index
    %c0_35 = arith.constant 0 : index
    %72 = vector.load %arg10[%c0_33, %c0_34, %c0_35] : memref<1x1x128xf32, #tpu.memory_space<vmem>>, vector<1x1x128xf32>
    %73 = vector.shape_cast %72 : vector<1x1x128xf32> to vector<1x128xf32>
    %c0_36 = arith.constant 0 : index
    %c0_37 = arith.constant 0 : index
    %c0_38 = arith.constant 0 : index
    %74 = vector.load %arg11[%c0_36, %c0_37, %c0_38] : memref<1x1x128xf32, #tpu.memory_space<vmem>>, vector<1x1x128xf32>
    %75 = vector.shape_cast %74 : vector<1x1x128xf32> to vector<1x128xf32>
    %cst_39 = arith.constant dense<0.000000e+00> : vector<8xf32>
    %76 = vector.multi_reduction <add>, %71, %cst_39 [1] : vector<8x128xf32> to vector<8xf32>
    %77 = vector.shape_cast %76 : vector<8xf32> to vector<8x1xf32>
    %cst_40 = arith.constant 1.280000e+02 : f32
    %78 = vector.broadcast %cst_40 : f32 to vector<8x1xf32>
    %79 = arith.divf %77, %78 : vector<8x1xf32>
    %80 = vector.broadcast %79 : vector<8x1xf32> to vector<8x128xf32>
    %81 = arith.subf %71, %80 : vector<8x128xf32>
    %82 = arith.mulf %81, %81 : vector<8x128xf32>
    %cst_41 = arith.constant dense<0.000000e+00> : vector<8xf32>
    %83 = vector.multi_reduction <add>, %82, %cst_41 [1] : vector<8x128xf32> to vector<8xf32>
    %84 = vector.shape_cast %83 : vector<8xf32> to vector<8x1xf32>
    %cst_42 = arith.constant 1.280000e+02 : f32
    %85 = vector.broadcast %cst_42 : f32 to vector<8x1xf32>
    %86 = arith.divf %84, %85 : vector<8x1xf32>
    %87 = vector.broadcast %79 : vector<8x1xf32> to vector<8x128xf32>
    %88 = arith.subf %71, %87 : vector<8x128xf32>
    %cst_43 = arith.constant 9.99999974E-6 : f32
    %89 = vector.broadcast %cst_43 : f32 to vector<8x1xf32>
    %90 = arith.addf %86, %89 : vector<8x1xf32>
    %91 = math.rsqrt %90 : vector<8x1xf32>
    %92 = vector.broadcast %91 : vector<8x1xf32> to vector<8x128xf32>
    %93 = arith.mulf %88, %92 : vector<8x128xf32>
    %94 = vector.broadcast %73 : vector<1x128xf32> to vector<8x128xf32>
    %95 = arith.mulf %93, %94 : vector<8x128xf32>
    %96 = vector.broadcast %75 : vector<1x128xf32> to vector<8x128xf32>
    %97 = arith.addf %95, %96 : vector<8x128xf32>
    %98 = arith.truncf %97 : vector<8x128xf32> to vector<8x128xbf16>
    %c0_44 = arith.constant 0 : index
    %c0_45 = arith.constant 0 : index
    %c0_46 = arith.constant 0 : index
    %99 = vector.load %arg12[%c0_44, %c0_45, %c0_46] : memref<1x128x512xbf16, #tpu.memory_space<vmem>>, vector<1x128x512xbf16>
    %100 = vector.shape_cast %99 : vector<1x128x512xbf16> to vector<128x512xbf16>
    %cst_47 = arith.constant dense<0.000000e+00> : vector<8x512xf32>
    %101 = tpu.matmul %98, %100, %cst_47 {dimension_numbers = #tpu.dot_dimension_numbers<[1], [0], [0], [1], [0, 0, 1, 1], [], []>} : vector<8x128xbf16>, vector<128x512xbf16>, vector<8x512xf32> -> vector<8x512xf32>
    %c0_48 = arith.constant 0 : index
    %c0_49 = arith.constant 0 : index
    %c0_50 = arith.constant 0 : index
    %102 = vector.load %arg13[%c0_48, %c0_49, %c0_50] : memref<1x1x512xf32, #tpu.memory_space<vmem>>, vector<1x1x512xf32>
    %103 = vector.shape_cast %102 : vector<1x1x512xf32> to vector<1x512xf32>
    %104 = vector.broadcast %103 : vector<1x512xf32> to vector<8x512xf32>
    %105 = arith.addf %101, %104 : vector<8x512xf32>
    %cst_51 = arith.constant 5.000000e-01 : f32
    %106 = vector.broadcast %cst_51 : f32 to vector<8x512xf32>
    %107 = arith.mulf %106, %105 : vector<8x512xf32>
    %cst_52 = arith.constant 4.471500e-02 : f32
    %108 = vector.broadcast %cst_52 : f32 to vector<8x512xf32>
    %109 = arith.mulf %108, %105 : vector<8x512xf32>
    %110 = arith.mulf %109, %105 : vector<8x512xf32>
    %111 = arith.mulf %110, %105 : vector<8x512xf32>
    %112 = arith.addf %105, %111 : vector<8x512xf32>
    %cst_53 = arith.constant 0.797884583 : f32
    %113 = vector.broadcast %cst_53 : f32 to vector<8x512xf32>
    %114 = arith.mulf %113, %112 : vector<8x512xf32>
    %115 = math.tanh %114 : vector<8x512xf32>
    %cst_54 = arith.constant 1.000000e+00 : f32
    %116 = vector.broadcast %cst_54 : f32 to vector<8x512xf32>
    %117 = arith.addf %116, %115 : vector<8x512xf32>
    %118 = arith.mulf %107, %117 : vector<8x512xf32>
    %119 = arith.truncf %118 : vector<8x512xf32> to vector<8x512xbf16>
    %c0_55 = arith.constant 0 : index
    %c0_56 = arith.constant 0 : index
    %c0_57 = arith.constant 0 : index
    %120 = vector.load %arg14[%c0_55, %c0_56, %c0_57] : memref<1x512x128xbf16, #tpu.memory_space<vmem>>, vector<1x512x128xbf16>
    %121 = vector.shape_cast %120 : vector<1x512x128xbf16> to vector<512x128xbf16>
    %cst_58 = arith.constant dense<0.000000e+00> : vector<8x128xf32>
    %122 = tpu.matmul %119, %121, %cst_58 {dimension_numbers = #tpu.dot_dimension_numbers<[1], [0], [0], [1], [0, 0, 1, 1], [], []>} : vector<8x512xbf16>, vector<512x128xbf16>, vector<8x128xf32> -> vector<8x128xf32>
    %c0_59 = arith.constant 0 : index
    %c0_60 = arith.constant 0 : index
    %c0_61 = arith.constant 0 : index
    %123 = vector.load %arg15[%c0_59, %c0_60, %c0_61] : memref<1x1x128xf32, #tpu.memory_space<vmem>>, vector<1x1x128xf32>
    %124 = vector.shape_cast %123 : vector<1x1x128xf32> to vector<1x128xf32>
    %125 = vector.broadcast %124 : vector<1x128xf32> to vector<8x128xf32>
    %126 = arith.addf %122, %125 : vector<8x128xf32>
    %127 = arith.addf %126, %97 : vector<8x128xf32>
    %c0_62 = arith.constant 0 : index
    %c0_63 = arith.constant 0 : index
    %c0_64 = arith.constant 0 : index
    %128 = vector.load %arg16[%c0_62, %c0_63, %c0_64] : memref<1x1x128xf32, #tpu.memory_space<vmem>>, vector<1x1x128xf32>
    %129 = vector.shape_cast %128 : vector<1x1x128xf32> to vector<1x128xf32>
    %c0_65 = arith.constant 0 : index
    %c0_66 = arith.constant 0 : index
    %c0_67 = arith.constant 0 : index
    %130 = vector.load %arg17[%c0_65, %c0_66, %c0_67] : memref<1x1x128xf32, #tpu.memory_space<vmem>>, vector<1x1x128xf32>
    %131 = vector.shape_cast %130 : vector<1x1x128xf32> to vector<1x128xf32>
    %cst_68 = arith.constant dense<0.000000e+00> : vector<8xf32>
    %132 = vector.multi_reduction <add>, %127, %cst_68 [1] : vector<8x128xf32> to vector<8xf32>
    %133 = vector.shape_cast %132 : vector<8xf32> to vector<8x1xf32>
    %cst_69 = arith.constant 1.280000e+02 : f32
    %134 = vector.broadcast %cst_69 : f32 to vector<8x1xf32>
    %135 = arith.divf %133, %134 : vector<8x1xf32>
    %136 = vector.broadcast %135 : vector<8x1xf32> to vector<8x128xf32>
    %137 = arith.subf %127, %136 : vector<8x128xf32>
    %138 = arith.mulf %137, %137 : vector<8x128xf32>
    %cst_70 = arith.constant dense<0.000000e+00> : vector<8xf32>
    %139 = vector.multi_reduction <add>, %138, %cst_70 [1] : vector<8x128xf32> to vector<8xf32>
    %140 = vector.shape_cast %139 : vector<8xf32> to vector<8x1xf32>
    %cst_71 = arith.constant 1.280000e+02 : f32
    %141 = vector.broadcast %cst_71 : f32 to vector<8x1xf32>
    %142 = arith.divf %140, %141 : vector<8x1xf32>
    %143 = vector.broadcast %135 : vector<8x1xf32> to vector<8x128xf32>
    %144 = arith.subf %127, %143 : vector<8x128xf32>
    %cst_72 = arith.constant 9.99999974E-6 : f32
    %145 = vector.broadcast %cst_72 : f32 to vector<8x1xf32>
    %146 = arith.addf %142, %145 : vector<8x1xf32>
    %147 = math.rsqrt %146 : vector<8x1xf32>
    %148 = vector.broadcast %147 : vector<8x1xf32> to vector<8x128xf32>
    %149 = arith.mulf %144, %148 : vector<8x128xf32>
    %150 = vector.broadcast %129 : vector<1x128xf32> to vector<8x128xf32>
    %151 = arith.mulf %149, %150 : vector<8x128xf32>
    %152 = vector.broadcast %131 : vector<1x128xf32> to vector<8x128xf32>
    %153 = arith.addf %151, %152 : vector<8x128xf32>
    %c0_73 = arith.constant 0 : index
    %c0_74 = arith.constant 0 : index
    %154 = vector.load %arg18[%c0_73, %c0_74] : memref<8x128xf32, #tpu.memory_space<vmem>>, vector<8x128xf32>
    tpu.vector_store %arg18[%c0_73, %c0_74], %153 {strides = array<i32>} : memref<8x128xf32, #tpu.memory_space<vmem>>, vector<8x128xf32>,
    return
  }
  func.func @transform_0(%arg0: i32, %arg1: i32) -> (i32, i32) {
    %c0_i32 = arith.constant 0 : i32
    %c0_i32_0 = arith.constant 0 : i32
    return %arg0, %c0_i32 : i32, i32
  }
  func.func @transform_1(%arg0: i32, %arg1: i32) -> (i32, i32, i32) {
    %c0_i32 = arith.constant 0 : i32
    %c0_i32_0 = arith.constant 0 : i32
    %c0_i32_1 = arith.constant 0 : i32
    return %arg0, %c0_i32, %c0_i32_0 : i32, i32, i32
  }
  func.func @transform_2(%arg0: i32, %arg1: i32) -> (i32, i32) {
    %c0_i32 = arith.constant 0 : i32
    %c0_i32_0 = arith.constant 0 : i32
    %c0_i32_1 = arith.constant 0 : i32
    return %c0_i32, %c0_i32_0 : i32, i32
  }
  func.func @transform_3(%arg0: i32, %arg1: i32) -> (i32, i32) {
    %c0_i32 = arith.constant 0 : i32
    %c0_i32_0 = arith.constant 0 : i32
    %c0_i32_1 = arith.constant 0 : i32
    return %c0_i32, %c0_i32_0 : i32, i32
  }
  func.func @transform_4(%arg0: i32, %arg1: i32) -> (i32, i32, i32) {
    %c0_i32 = arith.constant 0 : i32
    %c0_i32_0 = arith.constant 0 : i32
    %c0_i32_1 = arith.constant 0 : i32
    return %arg1, %c0_i32, %c0_i32_0 : i32, i32, i32
  }
  func.func @transform_5(%arg0: i32, %arg1: i32) -> (i32, i32, i32) {
    %c0_i32 = arith.constant 0 : i32
    %c0_i32_0 = arith.constant 0 : i32
    %c0_i32_1 = arith.constant 0 : i32
    return %arg1, %c0_i32, %c0_i32_0 : i32, i32, i32
  }
  func.func @transform_6(%arg0: i32, %arg1: i32) -> (i32, i32, i32) {
    %c0_i32 = arith.constant 0 : i32
    %c0_i32_0 = arith.constant 0 : i32
    %c0_i32_1 = arith.constant 0 : i32
    return %arg1, %c0_i32, %c0_i32_0 : i32, i32, i32
  }
  func.func @transform_7(%arg0: i32, %arg1: i32) -> (i32, i32, i32) {
    %c0_i32 = arith.constant 0 : i32
    %c0_i32_0 = arith.constant 0 : i32
    %c0_i32_1 = arith.constant 0 : i32
    return %arg1, %c0_i32, %c0_i32_0 : i32, i32, i32
  }
  func.func @transform_8(%arg0: i32, %arg1: i32) -> (i32, i32, i32) {
    %c0_i32 = arith.constant 0 : i32
    %c0_i32_0 = arith.constant 0 : i32
    %c0_i32_1 = arith.constant 0 : i32
    return %arg1, %c0_i32, %c0_i32_0 : i32, i32, i32
  }
  func.func @transform_9(%arg0: i32, %arg1: i32) -> (i32, i32, i32) {
    %c0_i32 = arith.constant 0 : i32
    %c0_i32_0 = arith.constant 0 : i32
    %c0_i32_1 = arith.constant 0 : i32
    return %arg1, %c0_i32, %c0_i32_0 : i32, i32, i32
  }
  func.func @transform_10(%arg0: i32, %arg1: i32) -> (i32, i32, i32) {
    %c0_i32 = arith.constant 0 : i32
    %c0_i32_0 = arith.constant 0 : i32
    %c0_i32_1 = arith.constant 0 : i32
    return %arg1, %c0_i32, %c0_i32_0 : i32, i32, i32
  }
  func.func @transform_11(%arg0: i32, %arg1: i32) -> (i32, i32, i32) {
    %c0_i32 = arith.constant 0 : i32
    %c0_i32_0 = arith.constant 0 : i32
    %c0_i32_1 = arith.constant 0 : i32
    return %arg1, %c0_i32, %c0_i32_0 : i32, i32, i32
  }
  func.func @transform_12(%arg0: i32, %arg1: i32) -> (i32, i32, i32) {
    %c0_i32 = arith.constant 0 : i32
    %c0_i32_0 = arith.constant 0 : i32
    %c0_i32_1 = arith.constant 0 : i32
    return %arg1, %c0_i32, %c0_i32_0 : i32, i32, i32
  }
  func.func @transform_13(%arg0: i32, %arg1: i32) -> (i32, i32, i32) {
    %c0_i32 = arith.constant 0 : i32
    %c0_i32_0 = arith.constant 0 : i32
    %c0_i32_1 = arith.constant 0 : i32
    return %arg1, %c0_i32, %c0_i32_0 : i32, i32, i32
  }
  func.func @transform_14(%arg0: i32, %arg1: i32) -> (i32, i32, i32) {
    %c0_i32 = arith.constant 0 : i32
    %c0_i32_0 = arith.constant 0 : i32
    %c0_i32_1 = arith.constant 0 : i32
    return %arg1, %c0_i32, %c0_i32_0 : i32, i32, i32
  }
  func.func @transform_15(%arg0: i32, %arg1: i32) -> (i32, i32, i32) {
    %c0_i32 = arith.constant 0 : i32
    %c0_i32_0 = arith.constant 0 : i32
    %c0_i32_1 = arith.constant 0 : i32
    return %arg1, %c0_i32, %c0_i32_0 : i32, i32, i32
  }
  func.func @transform_16(%arg0: i32, %arg1: i32) -> (i32, i32) {
    %c0_i32 = arith.constant 0 : i32
    %c0_i32_0 = arith.constant 0 : i32
    return %arg0, %c0_i32 : i32, i32
  }
}

</mosaic_0001>

<bundles_post_ra>
// kernel: roberta_forward.1
= control target key start
LH: loop header
LB: loop body
LE: loop exit
PB: predicated region body
PF: predicated region fallthrough
CT: control target
= control target key end

     0   :  { %s5104_s0 = inlined_call_operand.hbm [shape: f32[16,128], index: 0, kind: input, shape index: {}]   ;;  %s5105_s1 = inlined_call_operand.hbm [shape: f32[2,1,8], index: 1, kind: input, shape index: {}]   ;;  %s5106_s2 = inlined_call_operand.hbm [shape: f32[1,128], index: 2, kind: input, shape index: {}]   ;;  %s5107_s3 = inlined_call_operand.hbm [shape: f32[1,128], index: 3, kind: input, shape index: {}]   ;;  %s5108_s4 = inlined_call_operand.hbm [shape: bf16[2,128,384], index: 4, kind: input, shape index: {}]   ;;  %s5109_s5 = inlined_call_operand.hbm [shape: f32[2,1,384], index: 5, kind: input, shape index: {}]   ;;  %s5110_s6 = inlined_call_operand.hbm [shape: bf16[2,128,128], index: 6, kind: input, shape index: {}]   ;;  %s5111_s7 = inlined_call_operand.hbm [shape: f32[2,1,128], index: 7, kind: input, shape index: {}]   ;;  %s5112_s8 = inlined_call_operand.hbm [shape: f32[2,1,128], index: 8, kind: input, shape index: {}]   ;;  %s5113_s9 = inlined_call_operand.hbm [shape: f32[2,1,128], index: 9, kind: input, shape index: {}]   ;;  %s5114_s10 = inlined_call_operand.hbm [shape: bf16[2,128,512], index: 10, kind: input, shape index: {}]   ;;  %s5115_s11 = inlined_call_operand.hbm [shape: f32[2,1,512], index: 11, kind: input, shape index: {}]   ;;  %s5116_s12 = inlined_call_operand.hbm [shape: bf16[2,512,128], index: 12, kind: input, shape index: {}]   ;;  %s5117_s13 = inlined_call_operand.hbm [shape: f32[2,1,128], index: 13, kind: input, shape index: {}]   ;;  %s5118_s14 = inlined_call_operand.hbm [shape: f32[2,1,128], index: 14, kind: input, shape index: {}]   ;;  %s5119_s15 = inlined_call_operand.hbm [shape: f32[2,1,128], index: 15, kind: input, shape index: {}]   ;;  %s5120_s16 = inlined_call_operand.hbm [shape: f32[16,128], index: 16, kind: output, shape index: {}]  }
   0x1   :  { %5158 = sst [smem:[#allocation54_spill]] %s5104_s0 }
   0x2   :  { %5159 = sst [smem:[#allocation55_spill]] %s5105_s1 }
   0x3   :  { %5160 = sst [smem:[#allocation56_spill]] %s5106_s2 }
   0x4   :  { %5161 = sst [smem:[#allocation57_spill]] %s5107_s3 }
   0x5   :  { %5162 = sst [smem:[#allocation58_spill]] %s5108_s4 }
   0x6   :  { %5163 = sst [smem:[#allocation59_spill]] %s5109_s5 }
   0x7   :  { %5164 = sst [smem:[#allocation60_spill]] %s5110_s6 }
   0x8   :  { %5165 = sst [smem:[#allocation61_spill]] %s5114_s10 }
   0x9   :  { %5166 = sst [smem:[#allocation62_spill]] %s5115_s11 }
   0xa   :  { %5167 = sst [smem:[#allocation63_spill]] %s5116_s12 }
   0xb   :  { %5168 = sst [smem:[#allocation64_spill]] %s5117_s13 }
   0xc   :  { %5169 = sst [smem:[#allocation65_spill]] %s5118_s14 }
   0xd   :  { %5170 = sst [smem:[#allocation66_spill]] %s5119_s15 }
   0xe   :  { %5171 = sst [smem:[#allocation67_spill]] %s5120_s16 }
   0xf   :  { %21 = vsyncpa [#allocation4], 0 }
  0x10   :  { %23 = vsyncpa [#allocation4 + $0x1], 0 }
  0x11   :  { %24 = vsyncpa [#allocation7], 0 }
  0x12   :  { %26 = vsyncpa [#allocation7 + $0x1], 0 }
  0x13   :  { %27 = vsyncpa [#allocation10], 0 }
  0x14   :  { %28 = vsyncpa [#allocation5], 0 }
  0x15   :  { %30 = vsyncpa [#allocation5 + $0x1], 0  ;;  %s4088_s21 = smov 0   ;;  %s4090_s22 = smov 0  }
  0x16   :  { %s4092_s23 = smov 0   ;;  %s4094_s24 = smov 0  }
  0x17   :  { %s4096_s25 = smov 0   ;;  %s4098_s26 = smov 0  }
  0x18   :  { %s4100_s27 = smov 0   ;;  %s4102_s28 = smov 0  }
  0x19   :  { %s4104_s29 = smov 0   ;;  %s4106_s30 = smov 0  }
  0x1a   :  { %s4108_s0 = smov 0  }
  0x1b LB: > { %5172 = sst [smem:[#allocation41_spill]] %s3938_s22  ;;  %s4144_s17 = sadd.s32 4294967295, %s3974_s0   ;;  %s3974_s0 = sphi %s4108_s0, %s36_s0   ;;  %s3970_s30 = sphi %s4106_s30, %s5244_s30   ;;  %s3966_s29 = sphi %s4104_s29, %s5251_s29   ;;  %s3962_s28 = sphi %s4102_s28, %s5242_s28   ;;  %s3958_s27 = sphi %s4100_s27, %s5250_s27   ;;  %s3954_s26 = sphi %s4098_s26, %s5249_s26   ;;  %s3950_s25 = sphi %s4096_s25, %s5248_s25   ;;  %s3946_s24 = sphi %s4094_s24, %s5247_s24   ;;  %s3942_s23 = sphi %s4092_s23, %s5246_s23   ;;  %s3938_s22 = sphi %s4090_s22, %s5245_s22   ;;  %s3934_s21 = sphi %s4088_s21, %s5239_s21  }
  0x1c   : > { %5173 = sst [smem:[#allocation42_spill]] %s3946_s24  ;;  %s2753_s18 = sadd.s32 4294967294, %s3974_s0  }
  0x1d   : > { %5174 = sst [smem:[#allocation43_spill]] %s3958_s27  ;;  %s45_s19 = sadd.s32 1, %s3966_s29 }
  0x1e   : > { %5175 = sst [smem:[#allocation44_spill]] %s3962_s28  ;;  %s48_s20 = sadd.s32 1, %s3970_s30 }
  0x1f   : > { %5176 = sst [smem:[#allocation45_spill]] %s3970_s30  ;;  %p46_p0 = scmp.ge.s32.totalorder %s45_s19, 2 }
  0x20   : > { %s55_s16 = sadd.s32 1, %s3954_s26  ;;  %p5131_p1 = scmp.ne.s32.totalorder %s3954_s26, %s3950_s25 }
  0x21   : > { %p63_p2 = scmp.eq.s32.totalorder %s3974_s0, 0  ;;  %s5253_s19 = smov (%p46_p0, %s45_s19), 0 }
  0x22   : > { %5177 = sst [smem:[#allocation46_spill]] %s5253_s19  ;;  %s5255_s20 = smov (!%p46_p0, %s48_s20), %s3970_s30 }
  0x23   : > { %p4161_p3 = por %p63_p2, %p5131_p1  ;;  %p5130_p4 = scmp.ne.s32.totalorder %s3950_s25, %s3946_s24 }
  0x24   : > { %p50_p5 = scmp.ge.s32.totalorder %s5255_s20, 2  ;;  %p5142_p6 = scmp.eq.s32.totalorder %s4144_s17, 0 }
  0x25   : > { %s5178_s28 = scalar_select %p4161_p3, 1, 0 }
  0x26   : > { %s146_s27 = ssub.s32 %s3966_s29, %s5253_s19  ;;  %s149_s15 = sadd.s32 1, %s3942_s23 }
  0x27   : > { %s5257_s20 = smov (%p50_p5, %s5255_s20), 0  ;;  %p4178_p7 = por %p5142_p6, %p5130_p4 }
  0x28   : > { %5179 = sst [smem:[#allocation47_spill]] %s5257_s20  ;;  %p147_p8 = scmp.eq.s32.totalorder %s146_s27, 0 }
  0x29   : > { %s5180_s14 = scalar_select %p4178_p7, 1, 0 }
  0x2a   : > { %s52_s13 = ssub.s32 %s3970_s30, %s5257_s20  ;;  %p156_p9 = scmp.ne.s32.totalorder %s3942_s23, %s3938_s22 }
  0x2b   : > { %5181 = sst [smem:[#allocation48_spill]] %s5180_s14  ;;  %p53_p10 = scmp.eq.s32.totalorder %s52_s13, 0 }
  0x2c   : > { %p162_p11 = scmp.ne.s32.totalorder %s3938_s22, %s3934_s21  ;;  %p4196_p12 = por %p156_p9, %p63_p2 }
  0x2d   : > { %s4189_s19 = scalar_select %p147_p8, %s3942_s23, %s149_s15  }
  0x2e   : > { %s4192_s12 = scalar_select %p53_p10, %s3954_s26, %s55_s16  }
  0x2f   : > { %5182 = sst [smem:[#allocation49_spill]] %s4189_s19  ;;  %p4202_p13 = por %p162_p11, %p5142_p6 }
  0x30   : > { %5183 = sst [smem:[#allocation50_spill]] %s4192_s12  ;;  %p472_p0 = scmp.eq.s32.totalorder %s4144_s17, 3 }
  0x31   : > { %s5184_s11 = scalar_select %p4196_p12, 1, 0 }
  0x32   : > { %s5185_s10 = scalar_select %p4202_p13, 1, 0 }
  0x33   : > { %p478_p5 = scmp.eq.s32.totalorder %s2753_s18, 3  ;;  %p2754_p4 = scmp.ge.s32.totalorder %s3974_s0, 1 }
  0x34   : > { %5186 = sst [smem:[#allocation51_spill]] %s5185_s10  ;;  %p485_p1 = scmp.lt.s32.totalorder %s3974_s0, 5 }
  0x35   : > { %p5187_p7 = scmp.ne.s32.totalorder %s3954_s26, %s3950_s25  ;;  %p5190_p10 = scmp.ne.s32.totalorder %s3950_s25, %s3946_s24 }
  0x36   : > { %p4223_p2 = pnand %p2754_p4, %p485_p1  ;;  %s3976_s21 = smov [#allocation8]  }
  0x37   : > { %p4212_p8 = por %p472_p0, %p5187_p7  ;;  %p4219_p3 = por %p478_p5, %p5190_p10 }
  0x38   : > { %s5193_s16 = scalar_select %p4223_p2, 1, 0 }
  0x39   : > { %s5188_s13 = scalar_select %p4212_p8, 1, 0 }
  0x3a   : > { %s5191_s15 = scalar_select %p4219_p3, 1, 0 }
  0x3b   : > { %5189 = sst [smem:[#allocation52_spill]] %s5188_s13  ;;  %p3086_p9 = pneg %p4223_p2 }
  0x3c   : > { %5192 = sst [smem:[#allocation53_spill]] %s5191_s15  ;;  %s498_s27 = sshll.u32 %s3976_s21, 4  ;;  %s499_s27 = int_to_ptr.vmem [resolvable:$true] %s498_s27 }
  0x3d   : > { %s3977_s18 = smov [#allocation9]   ;;  %p4231_p7 = pnand %p3086_p9, %p5142_p6 }
  0x3e   : > { %s509_s20 = sshll.u32 %s3977_s18, 4  ;;  %s5195_s2 = sld [smem:[#allocation56_spill]]  ;;  %s4235_s20 = int_to_ptr.vmem [resolvable:$true] %s509_s20 }
  0x3f   : > { %p3346_p4 = pneg %p4231_p7 }
  0x44   : > { %s3344_s24 = scalar_lea.hbm %s5195_s2, 16 }
  0x45   : > { %p3345_p1 = scmp.ne.s32.totalorder %s5195_s2, %s3344_s24  ;;  %p3351_p5 = scmp.lt.u32.totalorder %s3344_s24, %s5195_s2 }
  0x47   : > { %p3347_p11 = pnand %p3346_p4, %p3345_p1 }
  0x49   : > { %p3348_p0 = pneg %p3347_p11 }
  0x4b   : > { %p3353_p10 = pnand %p3351_p5, %p3348_p0 }
  0x4d   : > { %3356 = shalt.err (!%p3353_p10)
}
  0x4e   : > { %s3357_s22 = scalar_lea.vmem %s499_s27, 16  ;;  %s3364_s10 = scalar_lea.vmem %s499_s27, 32 }
  0x4f   : > { %p3358_p9 = scmp.ne.s32.totalorder %s499_s27, %s3357_s22  ;;  %p3365_p8 = scmp.lt.s32.totalorder %s499_s27, %s499_s27 }
  0x50   : > { %p3366_p13 = scmp.lt.s32.totalorder %s3364_s10, %s3357_s22 }
  0x51   : > { %p3360_p6 = pnand %p3358_p9, %p3346_p4 }
  0x52   : > { %p3367_p2 = por %p3366_p13, %p3365_p8 }
  0x53   : > { %p3361_p3 = pneg %p3360_p6 }
  0x55   : > { %p3368_p12 = pnand %p3367_p2, %p3361_p3 }
  0x57   : > { %3371 = shalt.err (!%p3368_p12)
}
  0x58   : > { %3089 = dma.hbm_to_vmem [thread:$0]  (!%p4231_p7), %s5195_s2, 16, %s499_s27, [#allocation7]  }
  0x59   : > { %s5196_s3 = sld [smem:[#allocation57_spill]] }
  0x5f   : > { %s3372_s21 = scalar_lea.hbm %s5196_s3, 16 }
  0x60   : > { %p3373_p6 = scmp.ne.s32.totalorder %s5196_s3, %s3372_s21  ;;  %p3379_p12 = scmp.lt.u32.totalorder %s3372_s21, %s5196_s3 }
  0x62   : > { %p3375_p13 = pnand %p3373_p6, %p3346_p4 }
  0x64   : > { %p3376_p3 = pneg %p3375_p13 }
  0x66   : > { %p3381_p8 = pnand %p3379_p12, %p3376_p3 }
  0x68   : > { %3384 = shalt.err (!%p3381_p8)
}
  0x69   : > { %s3385_s27 = scalar_lea.vmem %s4235_s20, 16  ;;  %s3392_s14 = scalar_lea.vmem %s4235_s20, 32 }
  0x6a   : > { %p3386_p2 = scmp.ne.s32.totalorder %s4235_s20, %s3385_s27  ;;  %p3393_p0 = scmp.lt.s32.totalorder %s4235_s20, %s4235_s20 }
  0x6b   : > { %p3394_p5 = scmp.lt.s32.totalorder %s3392_s14, %s3385_s27 }
  0x6c   : > { %p3388_p1 = pnand %p3386_p2, %p3346_p4 }
  0x6d   : > { %p3395_p10 = por %p3394_p5, %p3393_p0 }
  0x6e   : > { %p3389_p11 = pneg %p3388_p1 }
  0x70   : > { %p3396_p9 = pnand %p3395_p10, %p3389_p11 }
  0x72   : > { %3399 = shalt.err (!%p3396_p9)
}
  0x73   : > { %3092 = dma.hbm_to_vmem [thread:$0]  (!%p4231_p7), %s5196_s3, 16, %s4235_s20, [#allocation10]  }
  0x74   : > { %p2757_p6 = scmp.ge.s32.totalorder %s3974_s0, 4 }
  0x75   : > { %s5150_s24 = sand.u32 (!%p2757_p6), 1, %s3974_s0   ;;  %s5149_s15 = sand.u32 (!%p2757_p6), 1, %s3954_s26  }
  0x76   : > { %516 = sbr.rel (%p2757_p6) target bundleno = 506 (0x1fa), region = 24  ;;  %s2758_s21 = sshll.u32 (!%p2757_p6), %s5149_s15, 3 }
  0x77   : > { %s2759_s18 = sshll.u32 (!%p2757_p6), %s3970_s30, 7  ;;  %s5197_s10 = sld [smem:[#allocation54_spill]] (!%p2757_p6) }
  0x78   : > { %s524_s20 = scalar_lea.vmem (!%p2757_p6), [#allocation3], %s2758_s21  ;;  %s4298_s19 = scalar_lea.sflag (!%p2757_p6), [#allocation4], %s5150_s24 }
  0x79   : > { %s531_s14 = sshll.u32 (!%p2757_p6), %s524_s20, 4  ;;  %p5198_p4 = scmp.ne.s32.totalorder (!%p2757_p6), %s5178_s28, 0  ;;  %s532_s14 = int_to_ptr.vmem [resolvable:$true] %s531_s14 }
  0x7d   : > { %s4294_s27 = scalar_lea.hbm %s5197_s10, %s2759_s18  ;;  %s3404_s18 = scalar_lea.hbm %s5197_s10, 256 }
  0x7e   : > { %s3400_s13 = scalar_lea.hbm %s4294_s27, 128  ;;  %p3405_p12 = scmp.lt.u32.totalorder %s4294_s27, %s5197_s10 }
  0x7f   : > { %p3401_p7 = scmp.ne.s32.totalorder %s4294_s27, %s3400_s13  ;;  %p3406_p8 = scmp.lt.u32.totalorder %s3404_s18, %s3400_s13 }
  0x80   : > { %p3408_p1 = scmp.lt.u32.totalorder %s3400_s13, %s4294_s27 }
  0x81   : > { %p3402_p13 = pnand %p3401_p7, %p5198_p4  ;;  %p3407_p2 = por %p3406_p8, %p3405_p12 }
  0x83   : > { %p3403_p3 = pneg %p3402_p13  ;;  %p3409_p11 = por %p3408_p1, %p3407_p2 }
  0x85   : > { %p3410_p0 = pnand %p3409_p11, %p3403_p3 }
  0x87   : > { %3413 = shalt.err (!%p3410_p0)
}
  0x88   : > { %s3414_s21 = scalar_lea.vmem %s532_s14, 128  ;;  %s3978_s20 = smov [#allocation3]  }
  0x89   : > { %p3415_p5 = scmp.ne.s32.totalorder %s532_s14, %s3414_s21  ;;  %s3418_s24 = sshll.u32 %s3978_s20, 4  ;;  %s3419_s24 = int_to_ptr.vmem [resolvable:$false] %s3418_s24 }
  0x8a   : > { %s3420_s2 = scalar_lea.vmem %s3419_s24, 256  ;;  %p3421_p6 = scmp.lt.s32.totalorder %s532_s14, %s3419_s24 }
  0x8b   : > { %p3416_p10 = pnand %p3415_p5, %p5198_p4  ;;  %p3422_p7 = scmp.lt.s32.totalorder %s3420_s2, %s3414_s21 }
  0x8d   : > { %p3417_p9 = pneg %p3416_p10  ;;  %p3423_p13 = por %p3422_p7, %p3421_p6 }
  0x8f   : > { %p3424_p8 = pnand %p3423_p13, %p3417_p9 }
  0x91   : > { %3427 = shalt.err (!%p3424_p8)
}
  0x92   : > { %3052 = dma.hbm_to_vmem [thread:$0]  (%p5198_p4), %s4294_s27, 128, %s532_s14, %s4298_s19  }
  0x93   : > { %s2760_s15 = sshll.u32 %s3970_s30, 4  ;;  %s5199_s1 = sld [smem:[#allocation55_spill]] }
  0x94   : > { %s5200_s24 = sand.u32 1, %s3954_s26   ;;  %s4329_s20 = sand.u32 1, %s3942_s23  }
  0x95   : > { %s541_s22 = scalar_lea.vmem [#allocation6], %s5200_s24  ;;  %s5201_s2 = sand.u32 1, %s3974_s0  }
  0x96   : > { %s548_s21 = sshll.u32 %s541_s22, 4  ;;  %s4333_s3 = scalar_lea.sflag [#allocation7], %s5201_s2  ;;  %s4326_s21 = int_to_ptr.vmem [resolvable:$true] %s548_s21 }
  0x99   : > { %s4322_s12 = scalar_lea.hbm %s5199_s1, %s2760_s15  ;;  %s3432_s13 = scalar_lea.hbm %s5199_s1, 32 }
  0x9a   : > { %s3428_s27 = scalar_lea.hbm %s4322_s12, 16  ;;  %p3433_p1 = scmp.lt.u32.totalorder %s4322_s12, %s5199_s1 }
  0x9b   : > { %p3429_p3 = scmp.ne.s32.totalorder %s4322_s12, %s3428_s27  ;;  %p3434_p11 = scmp.lt.u32.totalorder %s3432_s13, %s3428_s27 }
  0x9c   : > { %p3436_p5 = scmp.lt.u32.totalorder %s3428_s27, %s4322_s12 }
  0x9d   : > { %p3430_p12 = pnand %p3429_p3, %p5198_p4  ;;  %p3435_p0 = por %p3434_p11, %p3433_p1 }
  0x9f   : > { %p3431_p2 = pneg %p3430_p12  ;;  %p3437_p10 = por %p3436_p5, %p3435_p0 }
  0xa1   : > { %p3438_p9 = pnand %p3437_p10, %p3431_p2 }
  0xa3   : > { %3441 = shalt.err (!%p3438_p9)
}
  0xa4   : > { %s3442_s24 = scalar_lea.vmem %s4326_s21, 16  ;;  %s3979_s22 = smov [#allocation6]  }
  0xa5   : > { %p3443_p6 = scmp.ne.s32.totalorder %s4326_s21, %s3442_s24  ;;  %s3446_s2 = sshll.u32 %s3979_s22, 4  ;;  %s3447_s2 = int_to_ptr.vmem [resolvable:$false] %s3446_s2 }
  0xa6   : > { %s3448_s10 = scalar_lea.vmem %s3447_s2, 32  ;;  %p3449_p8 = scmp.lt.s32.totalorder %s4326_s21, %s3447_s2 }
  0xa7   : > { %p3444_p7 = pnand %p3443_p6, %p5198_p4  ;;  %p3450_p3 = scmp.lt.s32.totalorder %s3448_s10, %s3442_s24 }
  0xa9   : > { %p3445_p13 = pneg %p3444_p7  ;;  %p3451_p12 = por %p3450_p3, %p3449_p8 }
  0xab   : > { %p3452_p1 = pnand %p3451_p12, %p3445_p13 }
  0xad   : > { %3455 = shalt.err (!%p3452_p1)
}
  0xae   : > { %3053 = dma.hbm_to_vmem [thread:$0]  (%p5198_p4), %s4322_s12, 16, %s4326_s21, %s4333_s3  }
  0xaf   : > { %s3042_s27 = smul.u32 192, %s4329_s20  ;;  %s5202_s4 = sld [smem:[#allocation58_spill]] }
  0xb0   : > { %s3043_s14 = smul.u32 3072, %s3966_s29  ;;  %p5203_p11 = scmp.ne.s32.totalorder %s5184_s11, 0 }
  0xb1   : > { %s3044_s15 = smul.u32 3, %s4329_s20  ;;  %s559_s28 = scalar_lea.vmem [#allocation11], %s3042_s27 }
  0xb2   : > { %s566_s22 = sshll.u32 %s559_s28, 4  ;;  %s4365_s22 = int_to_ptr.vmem [resolvable:$true] %s566_s22 }
  0xb5   : > { %s4363_s24 = scalar_lea.hbm %s5202_s4, %s3043_s14  ;;  %s3460_s10 = scalar_lea.hbm %s5202_s4, 6144 }
  0xb6   : > { %s3456_s2 = scalar_lea.hbm %s4363_s24, 3072  ;;  %p3461_p5 = scmp.lt.u32.totalorder %s4363_s24, %s5202_s4 }
  0xb7   : > { %p3457_p2 = scmp.ne.s32.totalorder %s4363_s24, %s3456_s2  ;;  %p3462_p10 = scmp.lt.u32.totalorder %s3460_s10, %s3456_s2 }
  0xb8   : > { %p3464_p6 = scmp.lt.u32.totalorder %s3456_s2, %s4363_s24 }
  0xb9   : > { %p3458_p4 = pnand %p3457_p2, %p5203_p11  ;;  %p3463_p9 = por %p3462_p10, %p3461_p5 }
  0xbb   : > { %p3459_p0 = pneg %p3458_p4  ;;  %p3465_p7 = por %p3464_p6, %p3463_p9 }
  0xbd   : > { %p3466_p13 = pnand %p3465_p7, %p3459_p0 }
  0xbf   : > { %3469 = shalt.err (!%p3466_p13)
}
  0xc0   : > { %s3470_s27 = scalar_lea.vmem %s4365_s22, 3072  ;;  %s3980_s18 = smov [#allocation11]  }
  0xc1   : > { %p3471_p8 = scmp.ne.s32.totalorder %s4365_s22, %s3470_s27  ;;  %s3474_s28 = sshll.u32 %s3980_s18, 4  ;;  %s3475_s28 = int_to_ptr.vmem [resolvable:$false] %s3474_s28 }
  0xc2   : > { %s3476_s12 = scalar_lea.vmem %s3475_s28, 6144  ;;  %p3477_p1 = scmp.lt.s32.totalorder %s4365_s22, %s3475_s28 }
  0xc3   : > { %p3472_p3 = pnand %p3471_p8, %p5203_p11  ;;  %p3478_p2 = scmp.lt.s32.totalorder %s3476_s12, %s3470_s27 }
  0xc5   : > { %p3473_p12 = pneg %p3472_p3  ;;  %p3479_p4 = por %p3478_p2, %p3477_p1 }
  0xc7   : > { %p3480_p5 = pnand %p3479_p4, %p3473_p12 }
  0xc9   : > { %3483 = shalt.err (!%p3480_p5)
}
  0xca   : > { %s3981_s2 = smov 192   ;;  %s3982_s21 = smov 12  }
  0xcb   : > { %3054 = dma.hbm_to_vmem [thread:$0]  (%p5203_p11), %s4363_s24, 3072, %s4365_s22, %s4298_s19, %s3981_s2, %s3981_s2, %s3982_s21  }
  0xcc   : > { %s3045_s10 = smul.u32 48, %s3966_s29  ;;  %s580_s13 = scalar_lea.vmem [#allocation12], %s3044_s15 }
  0xcd   : > { %s588_s14 = sshll.u32 %s580_s13, 4  ;;  %s2763_s27 = sshll.u32 %s4329_s20, 6  ;;  %s4392_s14 = int_to_ptr.vmem [resolvable:$true] %s588_s14 }
  0xce   : > { %s5204_s5 = sld [smem:[#allocation59_spill]] }
  0xd4   : > { %s586_s12 = scalar_lea.hbm %s5204_s5, %s3045_s10  ;;  %s3488_s24 = scalar_lea.hbm %s5204_s5, 96 }
  0xd5   : > { %s3484_s1 = scalar_lea.hbm %s586_s12, 48  ;;  %p3489_p6 = scmp.lt.u32.totalorder %s586_s12, %s5204_s5 }
  0xd6   : > { %p3485_p0 = scmp.ne.s32.totalorder %s586_s12, %s3484_s1  ;;  %p3490_p7 = scmp.lt.u32.totalorder %s3488_s24, %s3484_s1 }
  0xd7   : > { %p3492_p8 = scmp.lt.u32.totalorder %s3484_s1, %s586_s12 }
  0xd8   : > { %p3486_p10 = pnand %p3485_p0, %p5203_p11  ;;  %p3491_p13 = por %p3490_p7, %p3489_p6 }
  0xda   : > { %p3487_p9 = pneg %p3486_p10  ;;  %p3493_p3 = por %p3492_p8, %p3491_p13 }
  0xdc   : > { %p3494_p12 = pnand %p3493_p3, %p3487_p9 }
  0xde   : > { %3497 = shalt.err (!%p3494_p12)
}
  0xdf   : > { %s3498_s15 = scalar_lea.vmem %s4392_s14, 48  ;;  %s3983_s4 = smov [#allocation12]  }
  0xe0   : > { %p3499_p1 = scmp.ne.s32.totalorder %s4392_s14, %s3498_s15  ;;  %s3502_s30 = sshll.u32 %s3983_s4, 4  ;;  %s3503_s30 = int_to_ptr.vmem [resolvable:$false] %s3502_s30 }
  0xe1   : > { %s3504_s21 = scalar_lea.vmem %s3503_s30, 96  ;;  %p3505_p5 = scmp.lt.s32.totalorder %s4392_s14, %s3503_s30 }
  0xe2   : > { %p3500_p2 = pnand %p3499_p1, %p5203_p11  ;;  %p3506_p0 = scmp.lt.s32.totalorder %s3504_s21, %s3498_s15 }
  0xe4   : > { %p3501_p4 = pneg %p3500_p2  ;;  %p3507_p10 = por %p3506_p0, %p3505_p5 }
  0xe6   : > { %p3508_p6 = pnand %p3507_p10, %p3501_p4 }
  0xe8   : > { %3511 = shalt.err (!%p3508_p6)
}
  0xe9   : > { %3055 = dma.hbm_to_vmem [thread:$0]  (%p5203_p11), %s586_s12, 48, %s4392_s14, %s4333_s3  }
  0xea   : > { %s2904_s1 = sshll.u32 %s3966_s29, 10  ;;  %s599_s10 = scalar_lea.vmem [#allocation13], %s2763_s27 }
  0xeb   : > { %s606_s13 = sshll.u32 %s599_s10, 4  ;;  %s5205_s6 = sld [smem:[#allocation60_spill]]  ;;  %s4423_s13 = int_to_ptr.vmem [resolvable:$true] %s606_s13 }
  0xf1   : > { %s4421_s24 = scalar_lea.hbm %s5205_s6, %s2904_s1  ;;  %s3516_s27 = scalar_lea.hbm %s5205_s6, 2048 }
  0xf2   : > { %s3512_s22 = scalar_lea.hbm %s4421_s24, 1024  ;;  %p3517_p8 = scmp.lt.u32.totalorder %s4421_s24, %s5205_s6 }
  0xf3   : > { %p3513_p9 = scmp.ne.s32.totalorder %s4421_s24, %s3512_s22  ;;  %p3518_p3 = scmp.lt.u32.totalorder %s3516_s27, %s3512_s22 }
  0xf4   : > { %p3520_p1 = scmp.lt.u32.totalorder %s3512_s22, %s4421_s24 }
  0xf5   : > { %p3514_p7 = pnand %p3513_p9, %p5203_p11  ;;  %p3519_p12 = por %p3518_p3, %p3517_p8 }
  0xf7   : > { %p3515_p13 = pneg %p3514_p7  ;;  %p3521_p2 = por %p3520_p1, %p3519_p12 }
  0xf9   : > { %p3522_p4 = pnand %p3521_p2, %p3515_p13 }
  0xfb   : > { %3525 = shalt.err (!%p3522_p4)
}
  0xfc   : > { %s3526_s4 = scalar_lea.vmem %s4423_s13, 1024  ;;  %s3984_s30 = smov [#allocation13]  }
  0xfd   : > { %p3527_p5 = scmp.ne.s32.totalorder %s4423_s13, %s3526_s4  ;;  %s3530_s21 = sshll.u32 %s3984_s30, 4  ;;  %s3531_s21 = int_to_ptr.vmem [resolvable:$false] %s3530_s21 }
  0xfe   : > { %s3532_s1 = scalar_lea.vmem %s3531_s21, 2048  ;;  %p3533_p6 = scmp.lt.s32.totalorder %s4423_s13, %s3531_s21 }
  0xff   : > { %p3528_p0 = pnand %p3527_p5, %p5203_p11  ;;  %p3534_p9 = scmp.lt.s32.totalorder %s3532_s1, %s3526_s4 }
 0x101   : > { %p3529_p10 = pneg %p3528_p0  ;;  %p3535_p7 = por %p3534_p9, %p3533_p6 }
 0x103   : > { %p3536_p8 = pnand %p3535_p7, %p3529_p10 }
 0x105   : > { %3539 = shalt.err (!%p3536_p8)
}
 0x106   : > { %s5153_s10 = smov 64   ;;  %s5154_s18 = smov 4  }
 0x107   : > { %3056 = dma.hbm_to_vmem [thread:$0]  (%p5203_p11), %s4421_s24, 1024, %s4423_s13, %s4298_s19, %s5153_s10, %s5153_s10, %s5154_s18  }
 0x108   : > { %s4451_s28 = sshll.u32 %s3966_s29, 4  ;;  %s619_s27 = scalar_lea.vmem [#allocation14], %s4329_s20 }
 0x109   : > { %s4457_s12 = scalar_lea.hbm %s5111_s7, %s4451_s28  ;;  %s626_s2 = sshll.u32 %s619_s27, 4  ;;  %s627_s2 = int_to_ptr.vmem [resolvable:$true] %s626_s2 }
 0x10a   : > { %s3540_s15 = scalar_lea.hbm %s4457_s12, 16  ;;  %s3544_s4 = scalar_lea.hbm %s5111_s7, 32 }
 0x10b   : > { %p3541_p13 = scmp.ne.s32.totalorder %s4457_s12, %s3540_s15  ;;  %p3545_p1 = scmp.lt.u32.totalorder %s4457_s12, %s5111_s7 }
 0x10c   : > { %p3546_p2 = scmp.lt.u32.totalorder %s3544_s4, %s3540_s15  ;;  %p3548_p5 = scmp.lt.u32.totalorder %s3540_s15, %s4457_s12 }
 0x10d   : > { %p3542_p3 = pnand %p3541_p13, %p5203_p11 }
 0x10e   : > { %p3547_p4 = por %p3546_p2, %p3545_p1 }
 0x10f   : > { %p3543_p12 = pneg %p3542_p3 }
 0x110   : > { %p3549_p0 = por %p3548_p5, %p3547_p4 }
 0x112   : > { %p3550_p10 = pnand %p3549_p0, %p3543_p12 }
 0x114   : > { %3553 = shalt.err (!%p3550_p10)
}
 0x115   : > { %s3554_s1 = scalar_lea.vmem %s627_s2, 16  ;;  %s3987_s22 = smov [#allocation14]  }
 0x116   : > { %p3555_p6 = scmp.ne.s32.totalorder %s627_s2, %s3554_s1  ;;  %s3558_s14 = sshll.u32 %s3987_s22, 4  ;;  %s3559_s14 = int_to_ptr.vmem [resolvable:$false] %s3558_s14 }
 0x117   : > { %s3560_s27 = scalar_lea.vmem %s3559_s14, 32  ;;  %p3561_p8 = scmp.lt.s32.totalorder %s627_s2, %s3559_s14 }
 0x118   : > { %p3556_p9 = pnand %p3555_p6, %p5203_p11  ;;  %p3562_p13 = scmp.lt.s32.totalorder %s3560_s27, %s3554_s1 }
 0x11a   : > { %p3557_p7 = pneg %p3556_p9  ;;  %p3563_p3 = por %p3562_p13, %p3561_p8 }
 0x11c   : > { %p3564_p1 = pnand %p3563_p3, %p3557_p7 }
 0x11e   : > { %3567 = shalt.err (!%p3564_p1)
}
 0x11f   : > { %3057 = dma.hbm_to_vmem [thread:$0]  (%p5203_p11), %s4457_s12, 16, %s627_s2, %s4333_s3  }
 0x120   : > { %s4482_s24 = scalar_lea.hbm %s5112_s8, %s4451_s28  ;;  %s636_s4 = scalar_lea.vmem [#allocation15], %s4329_s20 }
 0x121   : > { %s643_s30 = sshll.u32 %s636_s4, 4  ;;  %s3568_s21 = scalar_lea.hbm %s4482_s24, 16  ;;  %s644_s30 = int_to_ptr.vmem [resolvable:$true] %s643_s30 }
 0x122   : > { %p3569_p12 = scmp.ne.s32.totalorder %s4482_s24, %s3568_s21  ;;  %s3572_s12 = scalar_lea.hbm %s5112_s8, 32 }
 0x123   : > { %p3573_p5 = scmp.lt.u32.totalorder %s4482_s24, %s5112_s8  ;;  %p3574_p0 = scmp.lt.u32.totalorder %s3572_s12, %s3568_s21 }
 0x124   : > { %p3570_p2 = pnand %p3569_p12, %p5203_p11  ;;  %p3576_p6 = scmp.lt.u32.totalorder %s3568_s21, %s4482_s24 }
 0x125   : > { %p3575_p10 = por %p3574_p0, %p3573_p5 }
 0x126   : > { %p3571_p4 = pneg %p3570_p2 }
 0x127   : > { %p3577_p9 = por %p3576_p6, %p3575_p10 }
 0x129   : > { %p3578_p7 = pnand %p3577_p9, %p3571_p4 }
 0x12b   : > { %3581 = shalt.err (!%p3578_p7)
}
 0x12c   : > { %s3582_s27 = scalar_lea.vmem %s644_s30, 16  ;;  %s3988_s15 = smov [#allocation15]  }
 0x12d   : > { %p3583_p8 = scmp.ne.s32.totalorder %s644_s30, %s3582_s27  ;;  %s3586_s13 = sshll.u32 %s3988_s15, 4  ;;  %s3587_s13 = int_to_ptr.vmem [resolvable:$false] %s3586_s13 }
 0x12e   : > { %s3588_s4 = scalar_lea.vmem %s3587_s13, 32  ;;  %p3589_p1 = scmp.lt.s32.totalorder %s644_s30, %s3587_s13 }
 0x12f   : > { %p3584_p13 = pnand %p3583_p8, %p5203_p11  ;;  %p3590_p12 = scmp.lt.s32.totalorder %s3588_s4, %s3582_s27 }
 0x131   : > { %p3585_p3 = pneg %p3584_p13  ;;  %p3591_p2 = por %p3590_p12, %p3589_p1 }
 0x133   : > { %p3592_p0 = pnand %p3591_p2, %p3585_p3 }
 0x135   : > { %3595 = shalt.err (!%p3592_p0)
}
 0x136   : > { %3058 = dma.hbm_to_vmem [thread:$0]  (%p5203_p11), %s4482_s24, 16, %s644_s30, %s4298_s19  }
 0x137   : > { %s4507_s22 = scalar_lea.hbm %s5113_s9, %s4451_s28  ;;  %s653_s12 = scalar_lea.vmem [#allocation16], %s4329_s20 }
 0x138   : > { %s660_s2 = sshll.u32 %s653_s12, 4  ;;  %s5155_s14 = sshll.u32 %s4329_s20, 8  ;;  %s661_s2 = int_to_ptr.vmem [resolvable:$true] %s660_s2 }
 0x139   : > { %s3596_s27 = scalar_lea.hbm %s4507_s22, 16  ;;  %s3600_s30 = scalar_lea.hbm %s5113_s9, 32 }
 0x13a   : > { %p3597_p4 = scmp.ne.s32.totalorder %s4507_s22, %s3596_s27  ;;  %p3601_p6 = scmp.lt.u32.totalorder %s4507_s22, %s5113_s9 }
 0x13b   : > { %p3602_p9 = scmp.lt.u32.totalorder %s3600_s30, %s3596_s27  ;;  %p3604_p8 = scmp.lt.u32.totalorder %s3596_s27, %s4507_s22 }
 0x13c   : > { %p3598_p5 = pnand %p3597_p4, %p5203_p11 }
 0x13d   : > { %p3603_p7 = por %p3602_p9, %p3601_p6 }
 0x13e   : > { %p3599_p10 = pneg %p3598_p5 }
 0x13f   : > { %p3605_p13 = por %p3604_p8, %p3603_p7 }
 0x141   : > { %p3606_p3 = pnand %p3605_p13, %p3599_p10 }
 0x143   : > { %3609 = shalt.err (!%p3606_p3)
}
 0x144   : > { %s3610_s21 = scalar_lea.vmem %s661_s2, 16  ;;  %s3989_s1 = smov [#allocation16]  }
 0x145   : > { %p3611_p1 = scmp.ne.s32.totalorder %s661_s2, %s3610_s21  ;;  %s3614_s12 = sshll.u32 %s3989_s1, 4  ;;  %s3615_s12 = int_to_ptr.vmem [resolvable:$false] %s3614_s12 }
 0x146   : > { %s3616_s15 = scalar_lea.vmem %s3615_s12, 32  ;;  %p3617_p0 = scmp.lt.s32.totalorder %s661_s2, %s3615_s12 }
 0x147   : > { %p3612_p12 = pnand %p3611_p1, %p5203_p11  ;;  %p3618_p4 = scmp.lt.s32.totalorder %s3616_s15, %s3610_s21 }
 0x149   : > { %p3613_p2 = pneg %p3612_p12  ;;  %p3619_p5 = por %p3618_p4, %p3617_p0 }
 0x14b   : > { %p3620_p6 = pnand %p3619_p5, %p3613_p2 }
 0x14d   : > { %3623 = shalt.err (!%p3620_p6)
}
 0x14e   : > { %3059 = dma.hbm_to_vmem [thread:$0]  (%p5203_p11), %s4507_s22, 16, %s661_s2, %s4333_s3  }
 0x14f   : > { %s5156_s27 = sshll.u32 %s3966_s29, 12  ;;  %s5206_s13 = sld [smem:[#allocation61_spill]] }
 0x150   : > { %s671_s21 = scalar_lea.vmem [#allocation17], %s5155_s14  ;;  %s2772_s12 = sshll.u32 %s4329_s20, 2 }
 0x151   : > { %s678_s1 = sshll.u32 %s671_s21, 4  ;;  %s4539_s1 = int_to_ptr.vmem [resolvable:$true] %s678_s1 }
 0x155   : > { %s4535_s4 = scalar_lea.hbm %s5206_s13, %s5156_s27  ;;  %s3628_s24 = scalar_lea.hbm %s5206_s13, 8192 }
 0x156   : > { %s3624_s15 = scalar_lea.hbm %s4535_s4, 4096  ;;  %p3629_p8 = scmp.lt.u32.totalorder %s4535_s4, %s5206_s13 }
 0x157   : > { %p3625_p10 = scmp.ne.s32.totalorder %s4535_s4, %s3624_s15  ;;  %p3630_p13 = scmp.lt.u32.totalorder %s3628_s24, %s3624_s15 }
 0x158   : > { %p3632_p1 = scmp.lt.u32.totalorder %s3624_s15, %s4535_s4 }
 0x159   : > { %p3626_p9 = pnand %p3625_p10, %p5203_p11  ;;  %p3631_p3 = por %p3630_p13, %p3629_p8 }
 0x15b   : > { %p3627_p7 = pneg %p3626_p9  ;;  %p3633_p12 = por %p3632_p1, %p3631_p3 }
 0x15d   : > { %p3634_p2 = pnand %p3633_p12, %p3627_p7 }
 0x15f   : > { %3637 = shalt.err (!%p3634_p2)
}
 0x160   : > { %s3638_s21 = scalar_lea.vmem %s4539_s1, 4096  ;;  %s3990_s22 = smov [#allocation17]  }
 0x161   : > { %p3639_p0 = scmp.ne.s32.totalorder %s4539_s1, %s3638_s21  ;;  %s3642_s2 = sshll.u32 %s3990_s22, 4  ;;  %s3643_s2 = int_to_ptr.vmem [resolvable:$false] %s3642_s2 }
 0x162   : > { %s3644_s10 = scalar_lea.vmem %s3643_s2, 8192  ;;  %p3645_p6 = scmp.lt.s32.totalorder %s4539_s1, %s3643_s2 }
 0x163   : > { %p3640_p4 = pnand %p3639_p0, %p5203_p11  ;;  %p3646_p10 = scmp.lt.s32.totalorder %s3644_s10, %s3638_s21 }
 0x165   : > { %p3641_p5 = pneg %p3640_p4  ;;  %p3647_p9 = por %p3646_p10, %p3645_p6 }
 0x167   : > { %p3648_p8 = pnand %p3647_p9, %p3641_p5 }
 0x169   : > { %3651 = shalt.err (!%p3648_p8)
}
 0x16a   : > { %s3991_s15 = smov 256   ;;  %s3992_s24 = smov 16  }
 0x16b   : > { %3060 = dma.hbm_to_vmem [thread:$0]  (%p5203_p11), %s4535_s4, 4096, %s4539_s1, %s4298_s19, %s3991_s15, %s3991_s15, %s3992_s24  }
 0x16c   : > { %s2906_s30 = sshll.u32 %s3966_s29, 6  ;;  %s5207_s14 = sld [smem:[#allocation62_spill]] }
 0x16d   : > { %s692_s21 = scalar_lea.vmem [#allocation18], %s2772_s12 }
 0x16e   : > { %s700_s10 = sshll.u32 %s692_s21, 4  ;;  %s701_s10 = int_to_ptr.vmem [resolvable:$true] %s700_s10 }
 0x172   : > { %s4568_s2 = scalar_lea.hbm %s5207_s14, %s2906_s30  ;;  %s3656_s15 = scalar_lea.hbm %s5207_s14, 128 }
 0x173   : > { %s3652_s27 = scalar_lea.hbm %s4568_s2, 64  ;;  %p3657_p1 = scmp.lt.u32.totalorder %s4568_s2, %s5207_s14 }
 0x174   : > { %p3653_p7 = scmp.ne.s32.totalorder %s4568_s2, %s3652_s27  ;;  %p3658_p12 = scmp.lt.u32.totalorder %s3656_s15, %s3652_s27 }
 0x175   : > { %p3660_p0 = scmp.lt.u32.totalorder %s3652_s27, %s4568_s2 }
 0x176   : > { %p3654_p13 = pnand %p3653_p7, %p5203_p11  ;;  %p3659_p2 = por %p3658_p12, %p3657_p1 }
 0x178   : > { %p3655_p3 = pneg %p3654_p13  ;;  %p3661_p4 = por %p3660_p0, %p3659_p2 }
 0x17a   : > { %p3662_p5 = pnand %p3661_p4, %p3655_p3 }
 0x17c   : > { %3665 = shalt.err (!%p3662_p5)
}
 0x17d   : > { %s3666_s12 = scalar_lea.vmem %s701_s10, 64  ;;  %s3993_s30 = smov [#allocation18]  }
 0x17e   : > { %p3667_p6 = scmp.ne.s32.totalorder %s701_s10, %s3666_s12  ;;  %s3670_s22 = sshll.u32 %s3993_s30, 4  ;;  %s3671_s22 = int_to_ptr.vmem [resolvable:$false] %s3670_s22 }
 0x17f   : > { %s3672_s21 = scalar_lea.vmem %s3671_s22, 128  ;;  %p3673_p8 = scmp.lt.s32.totalorder %s701_s10, %s3671_s22 }
 0x180   : > { %p3668_p10 = pnand %p3667_p6, %p5203_p11  ;;  %p3674_p7 = scmp.lt.s32.totalorder %s3672_s21, %s3666_s12 }
 0x182   : > { %p3669_p9 = pneg %p3668_p10  ;;  %p3675_p13 = por %p3674_p7, %p3673_p8 }
 0x184   : > { %p3676_p1 = pnand %p3675_p13, %p3669_p9 }
 0x186   : > { %3679 = shalt.err (!%p3676_p1)
}
 0x187   : > { %3061 = dma.hbm_to_vmem [thread:$0]  (%p5203_p11), %s4568_s2, 64, %s701_s10, %s4333_s3  }
 0x188   : > { %s5208_s27 = sshll.u32 %s3966_s29, 12  ;;  %s5209_s15 = sld [smem:[#allocation63_spill]] }
 0x189   : > { %s5210_s24 = sshll.u32 %s4329_s20, 8 }
 0x18a   : > { %s711_s12 = scalar_lea.vmem [#allocation19], %s5210_s24 }
 0x18b   : > { %s718_s30 = sshll.u32 %s711_s12, 4  ;;  %s4599_s30 = int_to_ptr.vmem [resolvable:$true] %s718_s30 }
 0x18e   : > { %s4595_s18 = scalar_lea.hbm %s5209_s15, %s5208_s27  ;;  %s3684_s21 = scalar_lea.hbm %s5209_s15, 8192 }
 0x18f   : > { %s3680_s22 = scalar_lea.hbm %s4595_s18, 4096  ;;  %p3685_p0 = scmp.lt.u32.totalorder %s4595_s18, %s5209_s15 }
 0x190   : > { %p3681_p3 = scmp.ne.s32.totalorder %s4595_s18, %s3680_s22  ;;  %p3686_p4 = scmp.lt.u32.totalorder %s3684_s21, %s3680_s22 }
 0x191   : > { %p3688_p6 = scmp.lt.u32.totalorder %s3680_s22, %s4595_s18 }
 0x192   : > { %p3682_p12 = pnand %p3681_p3, %p5203_p11  ;;  %p3687_p5 = por %p3686_p4, %p3685_p0 }
 0x194   : > { %p3683_p2 = pneg %p3682_p12  ;;  %p3689_p10 = por %p3688_p6, %p3687_p5 }
 0x196   : > { %p3690_p9 = pnand %p3689_p10, %p3683_p2 }
 0x198   : > { %3693 = shalt.err (!%p3690_p9)
}
 0x199   : > { %s3694_s1 = scalar_lea.vmem %s4599_s30, 4096  ;;  %s3994_s24 = smov [#allocation19]  }
 0x19a   : > { %p3695_p8 = scmp.ne.s32.totalorder %s4599_s30, %s3694_s1  ;;  %s3698_s12 = sshll.u32 %s3994_s24, 4  ;;  %s3699_s12 = int_to_ptr.vmem [resolvable:$false] %s3698_s12 }
 0x19b   : > { %s3700_s2 = scalar_lea.vmem %s3699_s12, 8192  ;;  %p3701_p1 = scmp.lt.s32.totalorder %s4599_s30, %s3699_s12 }
 0x19c   : > { %p3696_p7 = pnand %p3695_p8, %p5203_p11  ;;  %p3702_p3 = scmp.lt.s32.totalorder %s3700_s2, %s3694_s1 }
 0x19e   : > { %p3697_p13 = pneg %p3696_p7  ;;  %p3703_p12 = por %p3702_p3, %p3701_p1 }
 0x1a0   : > { %p3704_p0 = pnand %p3703_p12, %p3697_p13 }
 0x1a2   : > { %3707 = shalt.err (!%p3704_p0)
}
 0x1a3   : > { %s5211_s22 = smov 4   ;;  %s5212_s10 = smov 64  }
 0x1a4   : > { %3062 = dma.hbm_to_vmem [thread:$0]  (%p5203_p11), %s4595_s18, 4096, %s4599_s30, %s4298_s19, %s5212_s10, %s5212_s10, %s5211_s22  }
 0x1a5   : > { %s5213_s4 = sld [smem:[#allocation64_spill]]  ;;  %s731_s1 = scalar_lea.vmem [#allocation20], %s4329_s20 }
 0x1a6   : > { %s738_s12 = sshll.u32 %s731_s1, 4  ;;  %s739_s12 = int_to_ptr.vmem [resolvable:$true] %s738_s12 }
 0x1ab   : > { %s4630_s24 = scalar_lea.hbm %s5213_s4, %s4451_s28  ;;  %s3712_s18 = scalar_lea.hbm %s5213_s4, 32 }
 0x1ac   : > { %s3708_s2 = scalar_lea.hbm %s4630_s24, 16  ;;  %p3713_p6 = scmp.lt.u32.totalorder %s4630_s24, %s5213_s4 }
 0x1ad   : > { %p3709_p2 = scmp.ne.s32.totalorder %s4630_s24, %s3708_s2  ;;  %p3714_p10 = scmp.lt.u32.totalorder %s3712_s18, %s3708_s2 }
 0x1ae   : > { %p3716_p8 = scmp.lt.u32.totalorder %s3708_s2, %s4630_s24 }
 0x1af   : > { %p3710_p4 = pnand %p3709_p2, %p5203_p11  ;;  %p3715_p9 = por %p3714_p10, %p3713_p6 }
 0x1b1   : > { %p3711_p5 = pneg %p3710_p4  ;;  %p3717_p7 = por %p3716_p8, %p3715_p9 }
 0x1b3   : > { %p3718_p13 = pnand %p3717_p7, %p3711_p5 }
 0x1b5   : > { %3721 = shalt.err (!%p3718_p13)
}
 0x1b6   : > { %s3722_s10 = scalar_lea.vmem %s739_s12, 16  ;;  %s3995_s21 = smov [#allocation20]  }
 0x1b7   : > { %p3723_p1 = scmp.ne.s32.totalorder %s739_s12, %s3722_s10  ;;  %s3726_s27 = sshll.u32 %s3995_s21, 4  ;;  %s3727_s27 = int_to_ptr.vmem [resolvable:$false] %s3726_s27 }
 0x1b8   : > { %s3728_s5 = scalar_lea.vmem %s3727_s27, 32  ;;  %p3729_p0 = scmp.lt.s32.totalorder %s739_s12, %s3727_s27 }
 0x1b9   : > { %p3724_p3 = pnand %p3723_p1, %p5203_p11  ;;  %p3730_p2 = scmp.lt.s32.totalorder %s3728_s5, %s3722_s10 }
 0x1bb   : > { %p3725_p12 = pneg %p3724_p3  ;;  %p3731_p4 = por %p3730_p2, %p3729_p0 }
 0x1bd   : > { %p3732_p6 = pnand %p3731_p4, %p3725_p12 }
 0x1bf   : > { %3735 = shalt.err (!%p3732_p6)
}
 0x1c0   : > { %3063 = dma.hbm_to_vmem [thread:$0]  (%p5203_p11), %s4630_s24, 16, %s739_s12, %s4333_s3  }
 0x1c1   : > { %s5214_s2 = sld [smem:[#allocation65_spill]]  ;;  %s748_s30 = scalar_lea.vmem [#allocation21], %s4329_s20 }
 0x1c2   : > { %s755_s22 = sshll.u32 %s748_s30, 4  ;;  %s756_s22 = int_to_ptr.vmem [resolvable:$true] %s755_s22 }
 0x1c7   : > { %s4655_s18 = scalar_lea.hbm %s5214_s2, %s4451_s28  ;;  %s3740_s24 = scalar_lea.hbm %s5214_s2, 32 }
 0x1c8   : > { %s3736_s10 = scalar_lea.hbm %s4655_s18, 16  ;;  %p3741_p8 = scmp.lt.u32.totalorder %s4655_s18, %s5214_s2 }
 0x1c9   : > { %p3737_p5 = scmp.ne.s32.totalorder %s4655_s18, %s3736_s10  ;;  %p3742_p7 = scmp.lt.u32.totalorder %s3740_s24, %s3736_s10 }
 0x1ca   : > { %p3744_p1 = scmp.lt.u32.totalorder %s3736_s10, %s4655_s18 }
 0x1cb   : > { %p3738_p10 = pnand %p3737_p5, %p5203_p11  ;;  %p3743_p13 = por %p3742_p7, %p3741_p8 }
 0x1cd   : > { %p3739_p9 = pneg %p3738_p10  ;;  %p3745_p3 = por %p3744_p1, %p3743_p13 }
 0x1cf   : > { %p3746_p12 = pnand %p3745_p3, %p3739_p9 }
 0x1d1   : > { %3749 = shalt.err (!%p3746_p12)
}
 0x1d2   : > { %s3750_s6 = scalar_lea.vmem %s756_s22, 16  ;;  %s3996_s1 = smov [#allocation21]  }
 0x1d3   : > { %p3751_p0 = scmp.ne.s32.totalorder %s756_s22, %s3750_s6  ;;  %s3754_s30 = sshll.u32 %s3996_s1, 4  ;;  %s3755_s30 = int_to_ptr.vmem [resolvable:$false] %s3754_s30 }
 0x1d4   : > { %s3756_s21 = scalar_lea.vmem %s3755_s30, 32  ;;  %p3757_p6 = scmp.lt.s32.totalorder %s756_s22, %s3755_s30 }
 0x1d5   : > { %p3752_p2 = pnand %p3751_p0, %p5203_p11  ;;  %p3758_p5 = scmp.lt.s32.totalorder %s3756_s21, %s3750_s6 }
 0x1d7   : > { %p3753_p4 = pneg %p3752_p2  ;;  %p3759_p10 = por %p3758_p5, %p3757_p6 }
 0x1d9   : > { %p3760_p7 = pnand %p3759_p10, %p3753_p4 }
 0x1db   : > { %3763 = shalt.err (!%p3760_p7)
}
 0x1dc   : > { %3064 = dma.hbm_to_vmem [thread:$0]  (%p5203_p11), %s4655_s18, 16, %s756_s22, %s4298_s19  }
 0x1dd   : > { %s5215_s24 = sld [smem:[#allocation66_spill]]  ;;  %s765_s6 = scalar_lea.vmem [#allocation22], %s4329_s20 }
 0x1de   : > { %s772_s1 = sshll.u32 %s765_s6, 4  ;;  %s773_s1 = int_to_ptr.vmem [resolvable:$true] %s772_s1 }
 0x1e3   : > { %s5216_s12 = smov %s5215_s24  ;;  %s4680_s5 = scalar_lea.hbm %s5215_s24, %s4451_s28 }
 0x1e4   : > { %s3764_s30 = scalar_lea.hbm %s4680_s5, 16  ;;  %s3768_s19 = scalar_lea.hbm %s5216_s12, 32 }
 0x1e5   : > { %p3765_p9 = scmp.ne.s32.totalorder %s4680_s5, %s3764_s30  ;;  %p3769_p1 = scmp.lt.u32.totalorder %s4680_s5, %s5216_s12 }
 0x1e6   : > { %p3770_p3 = scmp.lt.u32.totalorder %s3768_s19, %s3764_s30  ;;  %p3772_p0 = scmp.lt.u32.totalorder %s3764_s30, %s4680_s5 }
 0x1e7   : > { %p3766_p8 = pnand %p3765_p9, %p5203_p11 }
 0x1e8   : > { %p3771_p12 = por %p3770_p3, %p3769_p1 }
 0x1e9   : > { %p3767_p13 = pneg %p3766_p8 }
 0x1ea   : > { %p3773_p2 = por %p3772_p0, %p3771_p12 }
 0x1ec   : > { %p3774_p4 = pnand %p3773_p2, %p3767_p13 }
 0x1ee   : > { %3777 = shalt.err (!%p3774_p4)
}
 0x1ef   : > { %s3778_s20 = scalar_lea.vmem %s773_s1, 16  ;;  %s3997_s28 = smov [#allocation22]  }
 0x1f0   : > { %p3779_p6 = scmp.ne.s32.totalorder %s773_s1, %s3778_s20  ;;  %s3782_s10 = sshll.u32 %s3997_s28, 4  ;;  %s3783_s10 = int_to_ptr.vmem [resolvable:$false] %s3782_s10 }
 0x1f1   : > { %s3784_s2 = scalar_lea.vmem %s3783_s10, 32  ;;  %p3785_p7 = scmp.lt.s32.totalorder %s773_s1, %s3783_s10 }
 0x1f2   : > { %p3780_p5 = pnand %p3779_p6, %p5203_p11  ;;  %p3786_p9 = scmp.lt.s32.totalorder %s3784_s2, %s3778_s20 }
 0x1f4   : > { %p3781_p10 = pneg %p3780_p5  ;;  %p3787_p8 = por %p3786_p9, %p3785_p7 }
 0x1f6   : > { %p3788_p1 = pnand %p3787_p8, %p3781_p10 }
 0x1f8   : > { %3791 = shalt.err (!%p3788_p1)
}
 0x1f9   : > { %3065 = dma.hbm_to_vmem [thread:$0]  (%p5203_p11), %s4680_s5, 16, %s773_s1, %s4333_s3  }
 0x1fa PF: > { %p5217_p13 = scmp.ne.s32.totalorder %s5193_s16, 0 }
 0x1fb   : > { %s5218_s27 = sld [smem:[#allocation48_spill]] (!%p5217_p13)  ;;  %s783_s24 = sand.u32 (!%p5217_p13), 1, %s4144_s17  }
 0x1fc   : > { %781 = sbr.rel (%p5217_p13) target bundleno = 3554 (0xde2), region = 84  ;;  %s4705_s6 = sand.u32 (!%p5217_p13), 1, %s3950_s25  }
 0x1fd   : > { %s2782_s30 = sshll.u32 (!%p5217_p13), %s4705_s6, 3  ;;  %s4708_s21 = scalar_lea.sflag (!%p5217_p13), [#allocation4], %s783_s24 }
 0x1fe   : > { %s4712_s11 = scalar_lea.vmem (!%p5217_p13), [#allocation3], %s2782_s30 }
 0x201   : > { %p5219_p11 = scmp.ne.s32.totalorder (!%p5217_p13), %s5218_s27, 0 }
 0x203   : > { %3865 = dma.done.wait (%p5219_p11), %s4708_s21, 128  }
 0x204   : > { %3867 = vsyncadd (%p5219_p11), %s4708_s21, 4294967168  ;;  %s4720_s3 = scalar_lea.sflag [#allocation7], %s783_s24  ;;  %s795_s16 = scalar_lea.vmem [#allocation6], %s4705_s6 }
 0x205   : > { %3869 = dma.done.wait (%p5219_p11), %s4720_s3, 16  }
 0x206   : > { %3871 = vsyncadd (%p5219_p11), %s4720_s3, 4294967280  ;;  %p5220_p3 = scmp.eq.s32.totalorder %s4144_s17, 0 }
 0x208   : > { %3873 = dma.done.wait (%p5220_p3), [#allocation7], 16   ;;  %p5221_p12 = pmov %p5220_p3 }
 0x209   : > { %p5222_p0 = pmov %p5220_p3 }
 0x20a   : > { %3875 = vsyncadd (%p5221_p12), [#allocation7], 4294967280 }
 0x20b   : > { %3877 = dma.done.wait (%p5222_p0), [#allocation10], 16   ;;  %p5223_p2 = pmov %p5222_p0 }
 0x20c   : > { %s5224_s5 = sld [smem:[#allocation41_spill]]  ;;  %s5225_s1 = sld [smem:[#allocation51_spill]] }
 0x20d   : > { %3879 = vsyncadd (%p5223_p2), [#allocation10], 4294967280 }
 0x212   : > { %s4738_s19 = sand.u32 1, %s5224_s5   ;;  %p5226_p4 = scmp.ne.s32.totalorder %s5225_s1, 0 }
 0x213   : > { %s3046_s18 = smul.u32 192, %s4738_s19 }
 0x215   : > { %s4741_s22 = scalar_lea.vmem [#allocation11], %s3046_s18 }
 0x216   : > { %3881 = dma.done.wait (%p5226_p4), %s4708_s21, 3072  }
 0x217   : > { %3883 = vsyncadd (%p5226_p4), %s4708_s21, 4294964224  ;;  %s3047_s17 = smul.u32 3, %s4738_s19 }
 0x219   : > { %s4750_s20 = scalar_lea.vmem [#allocation12], %s3047_s17 }
 0x21a   : > { %3885 = dma.done.wait (%p5226_p4), %s4720_s3, 48  }
 0x21b   : > { %3887 = vsyncadd (%p5226_p4), %s4720_s3, 4294967248  ;;  %s2785_s28 = sshll.u32 %s4738_s19, 6 }
 0x21c   : > { %s4759_s10 = scalar_lea.vmem [#allocation13], %s2785_s28 }
 0x21d   : > { %3889 = dma.done.wait (%p5226_p4), %s4708_s21, 1024  }
 0x21e   : > { %3891 = vsyncadd (%p5226_p4), %s4708_s21, 4294966272  ;;  %s838_s2 = scalar_lea.vmem [#allocation14], %s4738_s19 }
 0x21f   : > { %3893 = dma.done.wait (%p5226_p4), %s4720_s3, 16  }
 0x220   : > { %3895 = vsyncadd (%p5226_p4), %s4720_s3, 4294967280 }
 0x221   : > { %3897 = dma.done.wait (%p5226_p4), %s4708_s21, 16  }
 0x222   : > { %3899 = vsyncadd (%p5226_p4), %s4708_s21, 4294967280 }
 0x223   : > { %3901 = dma.done.wait (%p5226_p4), %s4720_s3, 16  }
 0x224   : > { %3903 = vsyncadd (%p5226_p4), %s4720_s3, 4294967280  ;;  %s2786_s5 = sshll.u32 %s4738_s19, 8 }
 0x225   : > { %s4789_s18 = scalar_lea.vmem [#allocation17], %s2786_s5 }
 0x226   : > { %3905 = dma.done.wait (%p5226_p4), %s4708_s21, 4096  }
 0x227   : > { %3907 = vsyncadd (%p5226_p4), %s4708_s21, 4294963200  ;;  %s2787_s17 = sshll.u32 %s4738_s19, 2 }
 0x228   : > { %s4798_s28 = scalar_lea.vmem [#allocation18], %s2787_s17 }
 0x229   : > { %3909 = dma.done.wait (%p5226_p4), %s4720_s3, 64  }
 0x22a   : > { %3911 = vsyncadd (%p5226_p4), %s4720_s3, 4294967232  ;;  %s4806_s24 = scalar_lea.vmem [#allocation19], %s2786_s5 }
 0x22b   : > { %3913 = dma.done.wait (%p5226_p4), %s4708_s21, 4096  }
 0x22c   : > { %3915 = vsyncadd (%p5226_p4), %s4708_s21, 4294963200 }
 0x22d   : > { %3917 = dma.done.wait (%p5226_p4), %s4720_s3, 16  }
 0x22e   : > { %3919 = vsyncadd (%p5226_p4), %s4720_s3, 4294967280 }
 0x22f   : > { %3921 = dma.done.wait (%p5226_p4), %s4708_s21, 16  }
 0x230   : > { %3923 = vsyncadd (%p5226_p4), %s4708_s21, 4294967280  ;;  %s905_s17 = scalar_lea.vmem [#allocation22], %s4738_s19 }
 0x231   : > { %3925 = dma.done.wait (%p5226_p4), %s4720_s3, 16  }
 0x232   : > { %3927 = vsyncadd (%p5226_p4), %s4720_s3, 4294967280  ;;  %s4837_s27 = scalar_lea.vmem [#allocation23], %s2782_s30  ;;  %s5227_s5 = sld [smem:[#allocation43_spill]] }
 0x238   : > { %p2790_p6 = scmp.ne.s32.totalorder %s5227_s5, 0 }
 0x239   : > { %v1017_v0 = vld [vmem:[%s4712_s11] sm:$0xff] (!%p2790_p6)  ;;  %v2791_v9 = vld [vmem:[#allocation8] ss:$0 sm:$0xff] (!%p2790_p6)  ;;  %v2792_v11 = vld [vmem:[#allocation9] ss:$0 sm:$0xff] (!%p2790_p6) }
 0x23a   : > { %1016 = sbr.rel (%p2790_p6) target bundleno = 882 (0x372), region = 152  ;;  %1020 = vadd.xlane.f32.xlu0 (!%p2790_p6), %v1017_v0 }
 0x2c7   : > { %v1021_v1 = vpop.xlane.xlu0 %1020 }
 0x2c8   : > { %v1023_v2 = vmul.f32 0.0078125, %v1021_v1 }
 0x2ca   : > { %v1024_v3 = vsub.f32 %v1017_v0, %v1023_v2 }
 0x2cc   : > { %v1025_v4 = vmul.f32 %v1024_v3, %v1024_v3 }
 0x2ce   : > { %1026 = vadd.xlane.f32.xlu0 %v1025_v4 }
 0x35b   : > { %v1027_v5 = vpop.xlane.xlu0 %1026 }
 0x35c   : > { %v1028_v6 = vmul.f32 0.0078125, %v1027_v5 }
 0x35e   : > { %v1029_v7 = vadd.f32 1e-05, %v1028_v6 }
 0x360   : > { %3202 = vrsqrt.f32 %v1029_v7 }
 0x36a   : > { %v3203_v8 = vpop.eup %3202 }
 0x36b   : > { %v1031_v10 = vmul.f32 %v3203_v8, %v1024_v3 }
 0x36d   : > { %v1038_v12 = vmul.f32 %v2791_v9, %v1031_v10 }
 0x36f   : > { %v1045_v13 = vadd.f32 %v2792_v11, %v1038_v12 }
 0x371   : > { %1046 = vst [vmem:[%s4837_s27] sm:$0xff] %v1045_v13 }
 0x372 PF: > { %v3204_v14 = vld [vmem:[%s4741_s22 + $0x4] ss:$12 sps:$4 sm:$0xff]   ;;  %v3206_v15 = vld [vmem:[%s4741_s22] ss:$12 sps:$4 sm:$0xff]   ;;  %v3998_v16 = vmov 0   ;;  %v3999_v17 = vmov 0.0   ;;  %v1083_v42 = vlaneseq }
 0x373   : > { %1258 = vmatprep.mubr.bf16.mxu0 %v3998_v16  ;;  %2978 = vmatprep.subr.bf16.mxu1 %v3999_v17  ;;  %v3207_v18 = vld [vmem:[%s4741_s22 + $0x1c] ss:$12 sps:$4 sm:$0xff]   ;;  %v3209_v19 = vld [vmem:[%s4741_s22 + $0x18] ss:$12 sps:$4 sm:$0xff]   ;;  %v3210_v20 = vld [vmem:[%s4741_s22 + $0x34] ss:$12 sps:$4 sm:$0xff]  }
 0x374   : > { %1226 = vmatprep.subr.bf16.mxu0 %v3204_v14  ;;  %v3212_v21 = vld [vmem:[%s4741_s22 + $0x30] ss:$12 sps:$4 sm:$0xff]   ;;  %v3213_v22 = vld [vmem:[%s4741_s22 + $0x4c] ss:$12 sps:$4 sm:$0xff]   ;;  %v3215_v23 = vld [vmem:[%s4741_s22 + $0x48] ss:$12 sps:$4 sm:$0xff]  }
 0x375   : > { %1227 = vmatpush1.bf16.msra.mxu0 %v3206_v15  ;;  %v3228_v24 = vld [vmem:[%s4741_s22 + $0x8] ss:$12 sps:$4 sm:$0xff]   ;;  %v3216_v25 = vld [vmem:[%s4741_s22 + $0x64] ss:$12 sps:$4 sm:$0xff]   ;;  %v3229_v26 = vld [vmem:[%s4741_s22 + $0x20] ss:$12 sps:$4 sm:$0xff]  }
 0x376   : > { %1228 = vmatprep.subr.bf16.mxu0 %v3207_v18  ;;  %2979 = vmatpush3.bf16.msra.mxu1 %v3228_v24  ;;  %v3218_v27 = vld [vmem:[%s4741_s22 + $0x60] ss:$12 sps:$4 sm:$0xff]   ;;  %v3219_v28 = vld [vmem:[%s4741_s22 + $0x7c] ss:$12 sps:$4 sm:$0xff]   ;;  %v3221_v29 = vld [vmem:[%s4741_s22 + $0x78] ss:$12 sps:$4 sm:$0xff]  }
 0x377   : > { %2980 = vmatprep.subr.bf16.mxu1 %v3999_v17  ;;  %v3230_v30 = vld [vmem:[%s4741_s22 + $0x38] ss:$12 sps:$4 sm:$0xff]   ;;  %v3222_v31 = vld [vmem:[%s4741_s22 + $0x94] ss:$12 sps:$4 sm:$0xff]   ;;  %v3231_v32 = vld [vmem:[%s4741_s22 + $0x50] ss:$12 sps:$4 sm:$0xff]  }
 0x378   : > { %v3224_v33 = vld [vmem:[%s4741_s22 + $0x90] ss:$12 sps:$4 sm:$0xff]   ;;  %v3225_v34 = vld [vmem:[%s4741_s22 + $0xac] ss:$12 sps:$4 sm:$0xff]   ;;  %v3232_v35 = vld [vmem:[%s4741_s22 + $0x68] ss:$12 sps:$4 sm:$0xff]  }
 0x379   : > { %1229 = vmatpush1.bf16.msra.mxu0 %v3209_v19  ;;  %v3227_v36 = vld [vmem:[%s4741_s22 + $0xa8] ss:$12 sps:$4 sm:$0xff]   ;;  %v3233_v38 = vld [vmem:[%s4741_s22 + $0x80] ss:$12 sps:$4 sm:$0xff]   ;;  %v3234_v40 = vld [vmem:[%s4741_s22 + $0x98] ss:$12 sps:$4 sm:$0xff]  }
 0x37a   : > { %1230 = vmatprep.subr.bf16.mxu0 %v3210_v20  ;;  %2981 = vmatpush3.bf16.msra.mxu1 %v3229_v26  ;;  %v4869_v37 = vld [vmem:[%s4837_s27] sm:$0xff]  ;;  %vm4000_vm0 = vmmov 0   ;;  %v4888_v43 = vshrl.u32 %v1083_v42, 7  ;;  %vm1318_vm1 = vcmask 523264   ;;  %s4001_s30 = smov 64   ;;  %vm1379_vm2 = vcmask 1043456  }
 0x37b   : > { %2982 = vmatprep.subr.bf16.mxu1 %v3999_v17  ;;  %v1048_v39 = vpack.c.bf16 %v4869_v37, %v4869_v37  ;;  %v3235_v41 = vld [vmem:[%s4741_s22 + $0xb0] ss:$12 sps:$4 sm:$0xff]   ;;  %2994 = vmatprep.mubr.msk.bf16.mxu1 %vm4000_vm0, %v3999_v17  ;;  %v1081_v45 = vld [vmem:[%s4750_s20] sm:$0x7]  ;;  %vm1365_vm3 = vcmask 64512   ;;  %vm1543_vm4 = vcmask 1048064  }
 0x37c   : > { %v1085_v44 = vsub.s32 0, %v4888_v43  ;;  %v1089_v46 = vsub.s32 1, %v4888_v43  ;;  %v1093_v59 = vsub.s32 2, %v4888_v43  ;;  %v2817_v4 = vld [vmem:[%s795_s16] ss:$0 sm:$0xff]  ;;  %s5228_s21 = scalar_lea.vmem [#allocation15], %s4738_s19 }
 0x37d   : > { %1231 = vmatpush1.bf16.msra.mxu0 %v3212_v21  ;;  %s5229_s11 = scalar_lea.vmem [#allocation16], %s4738_s19  ;;  %s5230_s3 = scalar_lea.vmem [#allocation20], %s4738_s19 }
 0x37e   : > { %1232 = vmatprep.subr.bf16.mxu0 %v3213_v22  ;;  %2983 = vmatpush3.bf16.msra.mxu1 %v3230_v30  ;;  %v1086_v47 = vrot.slane %v1081_v45, %v1085_v44  ;;  %v1090_v48 = vrot.slane %v1081_v45, %v1089_v46  ;;  %v1094_v60 = vrot.slane %v1081_v45, %v1093_v59  ;;  %s5231_s16 = sld [smem:[#allocation44_spill]]  ;;  %s5232_s1 = sld [smem:[#allocation52_spill]] }
 0x37f   : > { %2984 = vmatprep.subr.bf16.mxu1 %v3999_v17  ;;  %s5233_s22 = scalar_lea.vmem [#allocation21], %s4738_s19  ;;  %s2397_s5 = scalar_lea.sflag [#allocation5], %s4705_s6 }
 0x380   : > { %s4002_s19 = smov [#allocation23]  }
 0x381   : > { %1233 = vmatpush1.bf16.msra.mxu0 %v3215_v23 }
 0x382   : > { %1234 = vmatprep.subr.bf16.mxu0 %v3216_v25  ;;  %2985 = vmatpush3.bf16.msra.mxu1 %v3231_v32 }
 0x383   : > { %2986 = vmatprep.subr.bf16.mxu1 %v3999_v17 }
 0x384   : > { %s2901_s20 = sshll.u32 %s5231_s16, 7  ;;  %p5235_p10 = scmp.ne.s32.totalorder %s5232_s1, 0 }
 0x385   : > { %1235 = vmatpush1.bf16.msra.mxu0 %v3218_v27 }
 0x386   : > { %1236 = vmatprep.subr.bf16.mxu0 %v3219_v28  ;;  %2987 = vmatpush3.bf16.msra.mxu1 %v3232_v35 }
 0x387   : > { %2988 = vmatprep.subr.bf16.mxu1 %v3999_v17 }
 0x389   : > { %1237 = vmatpush1.bf16.msra.mxu0 %v3221_v29 }
 0x38a   : > { %1238 = vmatprep.subr.bf16.mxu0 %v3222_v31  ;;  %2989 = vmatpush3.bf16.msra.mxu1 %v3233_v38 }
 0x38b   : > { %2990 = vmatprep.subr.bf16.mxu1 %v3999_v17 }
 0x38d   : > { %1239 = vmatpush1.bf16.msra.mxu0 %v3224_v33 }
 0x38e   : > { %1240 = vmatprep.subr.bf16.mxu0 %v3225_v34  ;;  %2991 = vmatpush3.bf16.msra.mxu1 %v3234_v40 }
 0x38f   : > { %2992 = vmatprep.subr.bf16.mxu1 %v3999_v17 }
 0x391   : > { %1241 = vmatpush1.bf16.msra.mxu0 %v3227_v36 }
 0x392   : > { %3022 = vmatprep.subr.bf16.mxu0 %v3999_v17  ;;  %2993 = vmatpush3.bf16.msra.mxu1 %v3235_v41 }
 0x393   : > { %2998 = vmatprep.subr.bf16.mxu1 %v3999_v17 }
 0x394   : > { %1259 = vmatmul.mubr.bf16.vlgmr.msra.gmra.mrb[0].mxu0 %v1048_v39 }
 0x395   : > { %3038 = vmatprep.mubr.msk.bf16.mxu0 %vm4000_vm0, %v3999_v17  ;;  %2995 = vmatmul.mubr.bf16.vlgmr.msra.gmra.mrb[0].mxu1 %v1048_v39 }
 0x396   : > { %3000 = vmatprep.mubr.msk.bf16.mxu1 %vm4000_vm0, %v3999_v17 }
 0x467   : > { %v1260_v49 = vpop.f32.mrb[0].mxu0 }
 0x468   : > { %v1261_v50 = vadd.f32 %v1260_v49, %v1086_v47  ;;  %v1262_v51 = vpop.f32.mrb[1].mxu0  ;;  %v1301_v61 = vpop.f32.mrb[0].mxu1  ;;  %v3236_v47 = vld [vmem:[%s4759_s10] sm:$0xff]   ;;  %v3238_v49 = vld [vmem:[%s4759_s10 + $0x10] sm:$0xff]  }
 0x469   : > { %v1263_v52 = vadd.f32 %v1262_v51, %v1090_v48  ;;  %v1264_v53 = vpop.f32.mrb[2].mxu0  ;;  %v1302_v62 = vadd.f32 %v1301_v61, %v1094_v60  ;;  %v2996_v63 = vpop.f32.mrb[1].mxu1  ;;  %3023 = vmatpush3.bf16.msra.mxu0 %v3236_v47  ;;  %v3237_v48 = vld [vmem:[%s4759_s10 + $0x8] sm:$0xff]   ;;  %v3240_v51 = vld [vmem:[%s4759_s10 + $0x20] sm:$0xff]  }
 0x46a   : > { %v1308_v54 = vmul.f32 0.125, %v1261_v50  ;;  %v1265_v55 = vpop.f32.mrb[3].mxu0  ;;  %v1304_v0 = vpop.f32.mrb[2].mxu1  ;;  %3024 = vmatprep.subr.bf16.mxu0 %v3999_v17  ;;  %v3239_v50 = vld [vmem:[%s4759_s10 + $0x18] sm:$0xff]  }
 0x46b   : > { %v1310_v56 = vpack.c.bf16 %v1263_v52, %v1263_v52  ;;  %v1311_v1 = vpack.c.bf16 %v1302_v62, %v1302_v62  ;;  %v2997_v2 = vpop.f32.mrb[3].mxu1  ;;  %v3241_v52 = vld [vmem:[%s4759_s10 + $0x28] sm:$0xff]   ;;  %v3243_v55 = vld [vmem:[%s4759_s10 + $0x38] sm:$0xff]  }
 0x46c   : > { %v1309_v57 = vpack.c.bf16 %v1308_v54, %v1308_v54  ;;  %v3242_v54 = vld [vmem:[%s4759_s10 + $0x30] sm:$0xff]   ;;  %s2410_s10 = sshll.u32 %s4837_s27, 4  ;;  %s5042_s10 = int_to_ptr.vmem [resolvable:$true] %s2410_s10 }
 0x46d   : > { %v1323_v58 = vsel %vm1318_vm1, %v1310_v56, 0  ;;  %v1381_v3 = vsel %vm1379_vm2, %v1311_v1, 0  ;;  %3025 = vmatpush3.bf16.msra.mxu0 %v3237_v48  ;;  %v3289_v47 = vld [vmem:[%s4789_s18 + $0xe8] ss:$16 sps:$4 sm:$0xff]  }
 0x46e   : > { %2999 = vmatpush3.bf16.xpose.msra.mxu1 %v1323_v58  ;;  %1427 = vrot.lane.b32.xlu1 %v1309_v57, %s4001_s30 }
 0x46f   : > { %3004 = vmatprep.subr.bf16.mxu1 %v3999_v17  ;;  %3026 = vmatprep.subr.bf16.mxu0 %v3999_v17 }
 0x471   : > { %3027 = vmatpush3.bf16.msra.mxu0 %v3238_v49 }
 0x472   : > { %3028 = vmatprep.subr.bf16.mxu0 %v3999_v17 }
 0x475   : > { %3001 = vmatmul.mubr.msk.bf16.vlgmr.msra.gmra.mrb[4].mxu1 %vm1318_vm1, %v1309_v57  ;;  %3029 = vmatpush3.bf16.msra.mxu0 %v3239_v50 }
 0x476   : > { %3006 = vmatprep.mubr.msk.bf16.mxu1 %vm4000_vm0, %v3999_v17  ;;  %3005 = vmatpush3.bf16.msra.mxu1 %v1381_v3 }
 0x477   : > { %3010 = vmatprep.subr.bf16.mxu1 %v3999_v17  ;;  %3030 = vmatprep.subr.bf16.mxu0 %v3999_v17 }
 0x479   : > { %3031 = vmatpush3.bf16.msra.mxu0 %v3240_v51 }
 0x47a   : > { %3032 = vmatprep.subr.bf16.mxu0 %v3999_v17 }
 0x47d   : > { %3033 = vmatpush3.bf16.msra.mxu0 %v3241_v52  ;;  %v2831_v52 = vld [vmem:[%s5228_s21] ss:$0 sm:$0xff] }
 0x47e   : > { %3034 = vmatprep.subr.bf16.mxu0 %v3999_v17 }
 0x481   : > { %3035 = vmatpush3.bf16.msra.mxu0 %v3242_v54  ;;  %v2832_v54 = vld [vmem:[%s5229_s11] ss:$0 sm:$0xff] }
 0x482   : > { %3036 = vmatprep.subr.bf16.mxu0 %v3999_v17 }
 0x485   : > { %3037 = vmatpush3.bf16.msra.mxu0 %v3243_v55 }
 0x4e0   : > { %v1428_v21 = vpop.permute.xlu1 %1427 }
 0x548   : > { %v1359_v5 = vpop.f32.mrb[4].mxu1 }
 0x549   : > { %v1360_v6 = vadd.f32 %v2817_v4, %v1359_v5  ;;  %v3002_v7 = vpop.f32.mrb[5].mxu1 }
 0x54a   : > { %v1362_v8 = vpop.f32.mrb[6].mxu1 }
 0x54b   : > { %v3003_v9 = vpop.f32.mrb[7].mxu1  ;;  %v1366_v10 = vsel %vm1365_vm3, %v1360_v6, -inf  ;;  %v3244_v8 = vld [vmem:[%s4789_s18] ss:$16 sps:$4 sm:$0xff]  }
 0x54c   : > { %1367 = vmax.xlane.f32.xlu0 %v1366_v10  ;;  %v3246_v9 = vld [vmem:[%s4789_s18 + $0x4] ss:$16 sps:$4 sm:$0xff]   ;;  %v3247_v10 = vld [vmem:[%s4789_s18 + $0x8] ss:$16 sps:$4 sm:$0xff]  }
 0x562   : > { %1430 = vrot.lane.b32.xlu0 %v1310_v56, %s4001_s30 }
 0x566   : > { %1489 = vrot.lane.b32.xlu0 %v1311_v1, %s4001_s30  ;;  %v2822_v1 = vld [vmem:[%s838_s2] ss:$0 sm:$0xff] }
 0x5d9   : > { %v1368_v11 = vpop.xlane.xlu0 %1367 }
 0x5da   : > { %v1369_v12 = vsub.f32 %v1360_v6, %v1368_v11  ;;  %v3249_v11 = vld [vmem:[%s4789_s18 + $0xc] ss:$16 sps:$4 sm:$0xff]  }
 0x5db   : > { %1943 = vmatprep.subr.bf16.mxu0 %v3249_v11  ;;  %v3309_v11 = vld [vmem:[%s4806_s24 + $0xe0] sm:$0xff]  }
 0x5dc   : > { %v1370_v13 = vmul.f32 1.442695, %v1369_v12  ;;  %v3255_v12 = vld [vmem:[%s4789_s18 + $0x2c] ss:$16 sps:$4 sm:$0xff]  }
 0x5dd   : > { %v1431_v15 = vpop.permute.xlu0 %1430 }
 0x5de   : > { %3324 = vpow2.f32 %v1370_v13  ;;  %v1436_v19 = vsel %vm1318_vm1, %v1431_v15, 0  ;;  %v3250_v13 = vld [vmem:[%s4789_s18 + $0x20] ss:$16 sps:$4 sm:$0xff]   ;;  %v3258_v15 = vld [vmem:[%s4789_s18 + $0x44] ss:$16 sps:$4 sm:$0xff]  }
 0x5e1   : > { %v1490_v20 = vpop.permute.xlu0 %1489 }
 0x5e2   : > { %v1495_v22 = vsel %vm1379_vm2, %v1490_v20, 0 }
 0x5e8   : > { %v3325_v14 = vpop.eup %3324 }
 0x5e9   : > { %v1375_v18 = vpack.c.bf16 %v3325_v14, %v3325_v14  ;;  %v1372_v33 = vsel %vm1365_vm3, %v3325_v14, 0.0  ;;  %v3253_v14 = vld [vmem:[%s4789_s18 + $0x28] ss:$16 sps:$4 sm:$0xff]  }
 0x5eb   : > { %3007 = vmatmul.mubr.msk.bf16.vlgmr.msra.gmra.mrb[8].mxu1 %vm1365_vm3, %v1375_v18  ;;  %v3256_v18 = vld [vmem:[%s4789_s18 + $0x40] ss:$16 sps:$4 sm:$0xff]  }
 0x5ec   : > { %3011 = vmatpush3.bf16.xpose.msra.mxu1 %v1436_v19  ;;  %3012 = vmatprep.mubr.msk.bf16.mxu1 %vm4000_vm0, %v3999_v17  ;;  %v3259_v19 = vld [vmem:[%s4789_s18 + $0x48] ss:$16 sps:$4 sm:$0xff]  }
 0x5ed   : > { %3016 = vmatprep.subr.bf16.mxu1 %v3999_v17 }
 0x5f3   : > { %3013 = vmatmul.mubr.msk.bf16.vlgmr.msra.gmra.mrb[12].mxu1 %vm1318_vm1, %v1428_v21 }
 0x5f4   : > { %3017 = vmatpush3.bf16.msra.mxu1 %v1495_v22  ;;  %3018 = vmatprep.mubr.msk.bf16.mxu1 %vm4000_vm0, %v3999_v17 }
 0x5f5   : > { %1902 = vmatprep.subr.bf16.mxu1 %v3246_v9  ;;  %v3307_v9 = vld [vmem:[%s4806_s24 + $0x98] sm:$0xff]  }
 0x6be   : > { %v1417_v23 = vpop.f32.mrb[8].mxu1 }
 0x6bf   : > { %v3008_v24 = vpop.f32.mrb[9].mxu1 }
 0x6c0   : > { %v1420_v25 = vpop.f32.mrb[10].mxu1  ;;  %v3264_v24 = vld [vmem:[%s4789_s18 + $0x64] ss:$16 sps:$4 sm:$0xff]  }
 0x6c1   : > { %v3009_v26 = vpop.f32.mrb[11].mxu1  ;;  %v3267_v25 = vld [vmem:[%s4789_s18 + $0x6c] ss:$16 sps:$4 sm:$0xff]  }
 0x6c2   : > { %v3262_v26 = vld [vmem:[%s4789_s18 + $0x60] ss:$16 sps:$4 sm:$0xff]  }
 0x6c6   : > { %v1472_v27 = vpop.f32.mrb[12].mxu1 }
 0x6c7   : > { %v1473_v28 = vadd.f32 %v2817_v4, %v1472_v27  ;;  %v3014_v29 = vpop.f32.mrb[13].mxu1  ;;  %v3265_v27 = vld [vmem:[%s4789_s18 + $0x68] ss:$16 sps:$4 sm:$0xff]  }
 0x6c8   : > { %v1475_v30 = vpop.f32.mrb[14].mxu1  ;;  %v3273_v29 = vld [vmem:[%s4789_s18 + $0x8c] ss:$16 sps:$4 sm:$0xff]  }
 0x6c9   : > { %v3015_v31 = vpop.f32.mrb[15].mxu1  ;;  %v1478_v32 = vsel %vm1365_vm3, %v1473_v28, -inf  ;;  %v3268_v30 = vld [vmem:[%s4789_s18 + $0x80] ss:$16 sps:$4 sm:$0xff]  }
 0x6ca   : > { %1479 = vmax.xlane.f32.xlu1 %v1478_v32  ;;  %v3271_v31 = vld [vmem:[%s4789_s18 + $0x88] ss:$16 sps:$4 sm:$0xff]   ;;  %v3276_v32 = vld [vmem:[%s4789_s18 + $0xa4] ss:$16 sps:$4 sm:$0xff]  }
 0x6ce   : > { %1373 = vadd.xlane.f32.xlu1 %v1372_v33  ;;  %v3279_v33 = vld [vmem:[%s4789_s18 + $0xac] ss:$16 sps:$4 sm:$0xff]  }
 0x757   : > { %v1480_v34 = vpop.xlane.xlu1 %1479 }
 0x758   : > { %v1481_v35 = vsub.f32 %v1473_v28, %v1480_v34  ;;  %v3270_v28 = vld [vmem:[%s4789_s18 + $0x84] ss:$16 sps:$4 sm:$0xff]   ;;  %v3274_v34 = vld [vmem:[%s4789_s18 + $0xa0] ss:$16 sps:$4 sm:$0xff]  }
 0x75a   : > { %v1482_v36 = vmul.f32 1.442695, %v1481_v35  ;;  %v3277_v35 = vld [vmem:[%s4789_s18 + $0xa8] ss:$16 sps:$4 sm:$0xff]  }
 0x75b   : > { %v1374_v38 = vpop.xlane.xlu1 %1373 }
 0x75c   : > { %3326 = vpow2.f32 %v1482_v36  ;;  %v3282_v36 = vld [vmem:[%s4789_s18 + $0xc4] ss:$16 sps:$4 sm:$0xff]  }
 0x75d   : > { %3328 = vrcp.f32 %v1374_v38  ;;  %v3285_v38 = vld [vmem:[%s4789_s18 + $0xcc] ss:$16 sps:$4 sm:$0xff]  }
 0x766   : > { %v3327_v39 = vpop.eup %3326 }
 0x767   : > { %v3329_v40 = vpop.eup %3328  ;;  %v1484_v41 = vsel %vm1365_vm3, %v3327_v39, 0.0  ;;  %v1487_v42 = vpack.c.bf16 %v3327_v39, %v3327_v39  ;;  %v3280_v39 = vld [vmem:[%s4789_s18 + $0xc0] ss:$16 sps:$4 sm:$0xff]  }
 0x768   : > { %1485 = vadd.xlane.f32.xlu0 %v1484_v41  ;;  %v1424_v45 = vmul.f32 %v3329_v40, %v1417_v23  ;;  %v3283_v40 = vld [vmem:[%s4789_s18 + $0xc8] ss:$16 sps:$4 sm:$0xff]   ;;  %v3288_v41 = vld [vmem:[%s4789_s18 + $0xe4] ss:$16 sps:$4 sm:$0xff]  }
 0x769   : > { %3019 = vmatmul.mubr.msk.bf16.vlgmr.msra.gmra.mrb[16].mxu1 %vm1365_vm3, %v1487_v42  ;;  %v3291_v42 = vld [vmem:[%s4789_s18 + $0xec] ss:$16 sps:$4 sm:$0xff]  }
 0x76a   : > { %1425 = vst.msk [vmem:[#allocation2] sm:$0xff] %vm1318_vm1, %v1424_v45  ;;  %1934 = vmatprep.mubr.bf16.mxu1 %v3998_v16  ;;  %1903 = vmatpush1.bf16.msra.mxu1 %v3244_v8  ;;  %v3286_v45 = vld [vmem:[%s4789_s18 + $0xe0] ss:$16 sps:$4 sm:$0xff]  }
 0x76b   : > { %v3306_v8 = vld [vmem:[%s4806_s24 + $0x18] sm:$0xff]  }
 0x7f5   : > { %v1486_v53 = vpop.xlane.xlu0 %1485 }
 0x7f6   : > { %3330 = vrcp.f32 %v1486_v53 }
 0x800   : > { %v3331_v56 = vpop.eup %3330 }
 0x83c   : > { %v1531_v57 = vpop.f32.mrb[16].mxu1 }
 0x83d   : > { %v1538_v58 = vmul.f32 %v3331_v56, %v1531_v57  ;;  %v3020_v60 = vpop.f32.mrb[17].mxu1 }
 0x83e   : > { %v1534_v61 = vpop.f32.mrb[18].mxu1  ;;  %v3293_v60 = vld [vmem:[%s4806_s24 + $0xc0] sm:$0xff]  }
 0x83f   : > { %1540 = vrot.lane.b32.xlu1 %v1538_v58, %s4001_s30  ;;  %v3021_v62 = vpop.f32.mrb[19].mxu1  ;;  %v3292_v58 = vld [vmem:[%s4806_s24 + $0x40] sm:$0xff]   ;;  %s3792_s30 = scalar_lea.vmem %s5042_s10, 128 }
 0x840   : > { %v3294_v61 = vld [vmem:[%s4806_s24] sm:$0xff]   ;;  %p3793_p5 = scmp.ne.s32.totalorder %s5042_s10, %s3792_s30 }
 0x841   : > { %v3295_v62 = vld [vmem:[%s4806_s24 + $0x80] sm:$0xff]  }
 0x842   : > { %p3794_p7 = pnand %p3793_p5, %p5235_p10 }
 0x844   : > { %p3795_p9 = pneg %p3794_p7 }
 0x8b1   : > { %v1541_v63 = vpop.permute.xlu1 %1540 }
 0x8b2   : > { %1544 = vst.msk [vmem:[#allocation2] sm:$0xff] %vm1543_vm4, %v1541_v63  ;;  %v3296_v63 = vld [vmem:[%s4806_s24 + $0x48] sm:$0xff]  }
 0x8b9   : > { %v1545_v0 = vld [vmem:[#allocation2] sm:$0xff] }
 0x8ba   : > { %v1546_v17 = vpack.c.bf16 %v1545_v0, %v1545_v0  ;;  %v3297_v0 = vld [vmem:[%s4806_s24 + $0xc8] sm:$0xff]  }
 0x8bc   : > { %3039 = vmatmul.mubr.bf16.vlgmr.msra.gmra.mrb[4].mxu0 %v1546_v17  ;;  %v3298_v17 = vld [vmem:[%s4806_s24 + $0x8] sm:$0xff]  }
 0x8bd   : > { %1975 = vmatprep.mubr.bf16.mxu0 %v3998_v16  ;;  %v3252_v16 = vld [vmem:[%s4789_s18 + $0x24] ss:$16 sps:$4 sm:$0xff]   ;;  %1944 = vmatpush1.bf16.msra.mxu0 %v3247_v10  ;;  %v3308_v10 = vld [vmem:[%s4806_s24 + $0x60] sm:$0xff]  }
 0x8be   : > { %1904 = vmatprep.subr.bf16.mxu1 %v3252_v16  ;;  %1945 = vmatprep.subr.bf16.mxu0 %v3255_v12  ;;  %v3310_v16 = vld [vmem:[%s4806_s24 + $0x20] sm:$0xff]  }
 0x8bf   : > { %1905 = vmatpush1.bf16.msra.mxu1 %v3250_v13  ;;  %v3311_v12 = vld [vmem:[%s4806_s24 + $0xa0] sm:$0xff]   ;;  %v3312_v13 = vld [vmem:[%s4806_s24 + $0x68] sm:$0xff]  }
 0x8c0   : > { %1906 = vmatprep.subr.bf16.mxu1 %v3258_v15  ;;  %v3314_v15 = vld [vmem:[%s4806_s24 + $0x28] sm:$0xff]  }
 0x8c1   : > { %1946 = vmatpush1.bf16.msra.mxu0 %v3253_v14  ;;  %v3313_v14 = vld [vmem:[%s4806_s24 + $0xe8] sm:$0xff]  }
 0x8c3   : > { %1907 = vmatpush1.bf16.msra.mxu1 %v3256_v18  ;;  %v3316_v18 = vld [vmem:[%s4806_s24 + $0x70] sm:$0xff]  }
 0x8c4   : > { %1908 = vmatprep.subr.bf16.mxu1 %v3264_v24  ;;  %v3322_v24 = vld [vmem:[%s4806_s24 + $0x38] sm:$0xff]  }
 0x8c7   : > { %1909 = vmatpush1.bf16.msra.mxu1 %v3262_v26  ;;  %v1720_v26 = vld [vmem:[%s4798_s28] sm:$0xf] }
 0x8c8   : > { %1910 = vmatprep.subr.bf16.mxu1 %v3270_v28  ;;  %v1725_v28 = vrot.slane %v1720_v26, %v1085_v44 }
 0x8cb   : > { %1911 = vmatpush1.bf16.msra.mxu1 %v3268_v30  ;;  %v1729_v30 = vrot.slane %v1720_v26, %v1089_v46 }
 0x8cc   : > { %1912 = vmatprep.subr.bf16.mxu1 %v3276_v32 }
 0x8cf   : > { %1913 = vmatpush1.bf16.msra.mxu1 %v3274_v34 }
 0x8d0   : > { %1914 = vmatprep.subr.bf16.mxu1 %v3282_v36 }
 0x8d3   : > { %1915 = vmatpush1.bf16.msra.mxu1 %v3280_v39 }
 0x8d4   : > { %1916 = vmatprep.subr.bf16.mxu1 %v3288_v41 }
 0x8d7   : > { %1917 = vmatpush1.bf16.msra.mxu1 %v3286_v45 }
 0x8d8   : > { %2934 = vmatprep.subr.bf16.mxu1 %v3292_v58 }
 0x98f   : > { %v1652_v2 = vpop.f32.mrb[4].mxu0 }
 0x990   : > { %v1653_v3 = vadd.f32 %v2822_v1, %v1652_v2  ;;  %v3040_v4 = vpop.f32.mrb[5].mxu0  ;;  %v3299_v1 = vld [vmem:[%s4806_s24 + $0x88] sm:$0xff]   ;;  %v3300_v2 = vld [vmem:[%s4806_s24 + $0x50] sm:$0xff]  }
 0x991   : > { %v1655_v5 = vpop.f32.mrb[6].mxu0  ;;  %v3302_v4 = vld [vmem:[%s4806_s24 + $0x10] sm:$0xff]  }
 0x992   : > { %v3041_v6 = vpop.f32.mrb[7].mxu0  ;;  %v1658_v7 = vadd.f32 %v1653_v3, %v4869_v37  ;;  %v3261_v37 = vld [vmem:[%s4789_s18 + $0x4c] ss:$16 sps:$4 sm:$0xff]   ;;  %s5234_s18 = sld [smem:[#allocation67_spill]] }
 0x993   : > { %1947 = vmatprep.subr.bf16.mxu0 %v3261_v37  ;;  %v3301_v3 = vld [vmem:[%s4806_s24 + $0xd0] sm:$0xff]   ;;  %v3304_v6 = vld [vmem:[%s4806_s24 + $0x58] sm:$0xff]   ;;  %v3315_v37 = vld [vmem:[%s4806_s24 + $0xa8] sm:$0xff]  }
 0x994   : > { %1661 = vadd.xlane.f32.xlu0 %v1658_v7  ;;  %1948 = vmatpush1.bf16.msra.mxu0 %v3259_v19  ;;  %v3303_v5 = vld [vmem:[%s4806_s24 + $0x90] sm:$0xff]  }
 0x995   : > { %1949 = vmatprep.subr.bf16.mxu0 %v3267_v25  ;;  %v3317_v19 = vld [vmem:[%s4806_s24 + $0xf0] sm:$0xff]   ;;  %v3323_v25 = vld [vmem:[%s4806_s24 + $0xb8] sm:$0xff]  }
 0x998   : > { %1950 = vmatpush1.bf16.msra.mxu0 %v3265_v27  ;;  %v1736_v27 = vsub.s32 3, %v4888_v43  ;;  %s5040_s28 = scalar_lea.hbm %s5234_s18, %s2901_s20 }
 0x999   : > { %1951 = vmatprep.subr.bf16.mxu0 %v3273_v29  ;;  %v1733_v29 = vrot.slane %v1720_v26, %v1093_v59 }
 0x99c   : > { %1952 = vmatpush1.bf16.msra.mxu0 %v3271_v31  ;;  %v1737_v31 = vrot.slane %v1720_v26, %v1736_v27 }
 0x99d   : > { %1953 = vmatprep.subr.bf16.mxu0 %v3279_v33 }
 0x9a0   : > { %1954 = vmatpush1.bf16.msra.mxu0 %v3277_v35 }
 0x9a1   : > { %1955 = vmatprep.subr.bf16.mxu0 %v3285_v38 }
 0x9a4   : > { %1956 = vmatpush1.bf16.msra.mxu0 %v3283_v40 }
 0x9a5   : > { %1957 = vmatprep.subr.bf16.mxu0 %v3291_v42 }
 0x9a8   : > { %1958 = vmatpush1.bf16.msra.mxu0 %v3289_v47 }
 0x9a9   : > { %2956 = vmatprep.subr.bf16.mxu0 %v3293_v60 }
 0xa21   : > { %v1662_v20 = vpop.xlane.xlu0 %1661 }
 0xa22   : > { %v1664_v21 = vmul.f32 0.0078125, %v1662_v20  ;;  %v3318_v20 = vld [vmem:[%s4806_s24 + $0x30] sm:$0xff]  }
 0xa24   : > { %v1665_v22 = vsub.f32 %v1658_v7, %v1664_v21  ;;  %v3305_v7 = vld [vmem:[%s4806_s24 + $0xd8] sm:$0xff]   ;;  %v3319_v21 = vld [vmem:[%s4806_s24 + $0xb0] sm:$0xff]  }
 0xa26   : > { %v1666_v23 = vmul.f32 %v1665_v22, %v1665_v22 }
 0xa28   : > { %1667 = vadd.xlane.f32.xlu1 %v1666_v23  ;;  %v3321_v23 = vld [vmem:[%s4806_s24 + $0xf8] sm:$0xff]  }
 0xab5   : > { %v1668_v48 = vpop.xlane.xlu1 %1667 }
 0xab6   : > { %v1669_v49 = vmul.f32 0.0078125, %v1668_v48 }
 0xab8   : > { %v1670_v50 = vadd.f32 1e-05, %v1669_v49 }
 0xaba   : > { %3332 = vrsqrt.f32 %v1670_v50 }
 0xac4   : > { %v3333_v51 = vpop.eup %3332 }
 0xac5   : > { %v1672_v53 = vmul.f32 %v3333_v51, %v1665_v22  ;;  %v3320_v22 = vld [vmem:[%s4806_s24 + $0x78] sm:$0xff]  }
 0xac7   : > { %v1679_v55 = vmul.f32 %v2831_v52, %v1672_v53 }
 0xac9   : > { %v4984_v56 = vadd.f32 %v2832_v54, %v1679_v55 }
 0xacb   : > { %v1687_v57 = vpack.c.bf16 %v4984_v56, %v4984_v56 }
 0xacd   : > { %1935 = vmatmul.mubr.bf16.vlgmr.msra.gmra.mrb[20].mxu1 %v1687_v57  ;;  %1976 = vmatmul.mubr.bf16.vlgmr.msra.gmra.mrb[8].mxu0 %v1687_v57 }
 0xace   : > { %2935 = vmatpush3.bf16.msra.mxu1 %v3294_v61  ;;  %2957 = vmatpush3.bf16.msra.mxu0 %v3295_v62 }
 0xacf   : > { %2936 = vmatprep.subr.bf16.mxu1 %v3296_v63  ;;  %2958 = vmatprep.subr.bf16.mxu0 %v3297_v0 }
 0xad2   : > { %2937 = vmatpush3.bf16.msra.mxu1 %v3298_v17  ;;  %2959 = vmatpush3.bf16.msra.mxu0 %v3299_v1 }
 0xad3   : > { %2938 = vmatprep.subr.bf16.mxu1 %v3300_v2  ;;  %2960 = vmatprep.subr.bf16.mxu0 %v3301_v3 }
 0xad6   : > { %2939 = vmatpush3.bf16.msra.mxu1 %v3302_v4  ;;  %2961 = vmatpush3.bf16.msra.mxu0 %v3303_v5 }
 0xad7   : > { %2940 = vmatprep.subr.bf16.mxu1 %v3304_v6  ;;  %2962 = vmatprep.subr.bf16.mxu0 %v3305_v7 }
 0xada   : > { %2941 = vmatpush3.bf16.msra.mxu1 %v3306_v8  ;;  %2963 = vmatpush3.bf16.msra.mxu0 %v3307_v9 }
 0xadb   : > { %2942 = vmatprep.subr.bf16.mxu1 %v3308_v10  ;;  %2964 = vmatprep.subr.bf16.mxu0 %v3309_v11 }
 0xade   : > { %2943 = vmatpush3.bf16.msra.mxu1 %v3310_v16  ;;  %2965 = vmatpush3.bf16.msra.mxu0 %v3311_v12 }
 0xadf   : > { %2944 = vmatprep.subr.bf16.mxu1 %v3312_v13  ;;  %2966 = vmatprep.subr.bf16.mxu0 %v3313_v14 }
 0xae2   : > { %2945 = vmatpush3.bf16.msra.mxu1 %v3314_v15  ;;  %2967 = vmatpush3.bf16.msra.mxu0 %v3315_v37 }
 0xae3   : > { %2946 = vmatprep.subr.bf16.mxu1 %v3316_v18  ;;  %2968 = vmatprep.subr.bf16.mxu0 %v3317_v19 }
 0xae6   : > { %2947 = vmatpush3.bf16.msra.mxu1 %v3318_v20  ;;  %2969 = vmatpush3.bf16.msra.mxu0 %v3319_v21 }
 0xae7   : > { %2948 = vmatprep.subr.bf16.mxu1 %v3320_v22  ;;  %2970 = vmatprep.subr.bf16.mxu0 %v3321_v23  ;;  %v2865_v23 = vld [vmem:[%s5230_s3] ss:$0 sm:$0xff] }
 0xaea   : > { %2949 = vmatpush3.bf16.msra.mxu1 %v3322_v24  ;;  %2971 = vmatpush3.bf16.msra.mxu0 %v3323_v25 }
 0xba0   : > { %v1936_v32 = vpop.f32.mrb[20].mxu1  ;;  %v1977_v33 = vpop.f32.mrb[8].mxu0 }
 0xba1   : > { %v1937_v34 = vadd.f32 %v1936_v32, %v1725_v28  ;;  %v1978_v35 = vadd.f32 %v1977_v33, %v1733_v29  ;;  %v1938_v36 = vpop.f32.mrb[21].mxu1  ;;  %v1979_v38 = vpop.f32.mrb[9].mxu0 }
 0xba2   : > { %v1939_v39 = vadd.f32 %v1938_v36, %v1729_v30  ;;  %v1980_v40 = vadd.f32 %v1979_v38, %v1737_v31  ;;  %v1940_v41 = vpop.f32.mrb[22].mxu1  ;;  %v1981_v42 = vpop.f32.mrb[10].mxu0 }
 0xba3   : > { %v1988_v45 = vmul.f32 0.044715, %v1937_v34  ;;  %v1990_v47 = vmul.f32 0.044715, %v1978_v35  ;;  %v1941_v44 = vpop.f32.mrb[23].mxu1  ;;  %v1982_v48 = vpop.f32.mrb[11].mxu0 }
 0xba4   : > { %v1989_v49 = vmul.f32 0.044715, %v1939_v39  ;;  %v1991_v59 = vmul.f32 0.044715, %v1980_v40  ;;  %v1984_v3 = vmul.f32 0.5, %v1937_v34  ;;  %v1985_v6 = vmul.f32 0.5, %v1939_v39 }
 0xba5   : > { %v1992_v50 = vmul.f32 %v1988_v45, %v1937_v34  ;;  %v1994_v43 = vmul.f32 %v1990_v47, %v1978_v35  ;;  %v1987_v9 = vmul.f32 0.5, %v1980_v40  ;;  %v1986_v12 = vmul.f32 0.5, %v1978_v35  ;;  %v2898_v47 = vld [vmem:[%s5233_s22] ss:$0 sm:$0xff] }
 0xba6   : > { %v1993_v46 = vmul.f32 %v1989_v49, %v1939_v39  ;;  %v1995_v51 = vmul.f32 %v1991_v59, %v1980_v40 }
 0xba7   : > { %v1996_v52 = vmul.f32 %v1992_v50, %v1937_v34  ;;  %v1998_v53 = vmul.f32 %v1994_v43, %v1978_v35 }
 0xba8   : > { %v1997_v54 = vmul.f32 %v1993_v46, %v1939_v39  ;;  %v1999_v55 = vmul.f32 %v1995_v51, %v1980_v40 }
 0xba9   : > { %v2000_v57 = vadd.f32 %v1996_v52, %v1937_v34  ;;  %v2002_v58 = vadd.f32 %v1998_v53, %v1978_v35 }
 0xbaa   : > { %v2001_v60 = vadd.f32 %v1997_v54, %v1939_v39  ;;  %v2003_v61 = vadd.f32 %v1999_v55, %v1980_v40 }
 0xbab   : > { %v2004_v62 = vmul.f32 0.7978846, %v2000_v57  ;;  %v2006_v17 = vmul.f32 0.7978846, %v2002_v58 }
 0xbac   : > { %v2005_v63 = vmul.f32 0.7978846, %v2001_v60  ;;  %v2007_v0 = vmul.f32 0.7978846, %v2003_v61 }
 0xbad   : > { %3334 = vtanh.f32 %v2004_v62 }
 0xbae   : > { %3336 = vtanh.f32 %v2005_v63 }
 0xbaf   : > { %3338 = vtanh.f32 %v2007_v0 }
 0xbb0   : > { %3340 = vtanh.f32 %v2006_v17 }
 0xbb7   : > { %v3335_v1 = vpop.eup %3334 }
 0xbb8   : > { %v3337_v2 = vpop.eup %3336  ;;  %v2012_v4 = vadd.f32 1.0, %v3335_v1 }
 0xbb9   : > { %v3339_v5 = vpop.eup %3338  ;;  %v2013_v7 = vadd.f32 1.0, %v3337_v2 }
 0xbba   : > { %v3341_v8 = vpop.eup %3340  ;;  %v2015_v10 = vadd.f32 1.0, %v3339_v5  ;;  %v2016_v11 = vmul.f32 %v2012_v4, %v1984_v3 }
 0xbbb   : > { %v2017_v16 = vmul.f32 %v2013_v7, %v1985_v6  ;;  %v2014_v13 = vadd.f32 1.0, %v3341_v8 }
 0xbbc   : > { %v2019_v14 = vmul.f32 %v2015_v10, %v1987_v9  ;;  %v2020_v19 = vpack.c.bf16 %v2016_v11, %v2016_v11 }
 0xbbd   : > { %v2021_v15 = vpack.c.bf16 %v2017_v16, %v2017_v16  ;;  %v2018_v37 = vmul.f32 %v2014_v13, %v1986_v12 }
 0xbbe   : > { %v2023_v18 = vpack.c.bf16 %v2019_v14, %v2019_v14 }
 0xbbf   : > { %2319 = vmatprep.mubr.bf16.mxu1 %v2021_v15  ;;  %v2022_v20 = vpack.c.bf16 %v2018_v37, %v2018_v37 }
 0xbc0   : > { %2359 = vmatprep.mubr.bf16.mxu0 %v2023_v18  ;;  %2320 = vmatmul.mubr.bf16.vlgmr.msra.gmra.mrb[24].mxu1 %v2020_v19 }
 0xbc1   : > { %2360 = vmatmul.mubr.bf16.vlgmr.msra.gmra.mrb[12].mxu0 %v2022_v20 }
 0xc93   : > { %v2950_v21 = vpop.f32.mrb[24].mxu1 }
 0xc94   : > { %v2972_v22 = vpop.f32.mrb[12].mxu0  ;;  %v2951_v24 = vpop.f32.mrb[25].mxu1 }
 0xc95   : > { %v2952_v25 = vadd.f32 %v2951_v24, %v2950_v21  ;;  %v2973_v26 = vpop.f32.mrb[13].mxu0  ;;  %v2953_v27 = vpop.f32.mrb[26].mxu1 }
 0xc96   : > { %v2974_v28 = vadd.f32 %v2973_v26, %v2972_v22  ;;  %v2975_v29 = vpop.f32.mrb[14].mxu0  ;;  %v2954_v30 = vpop.f32.mrb[27].mxu1 }
 0xc97   : > { %v2322_v31 = vadd.f32 %v2952_v25, %v2865_v23  ;;  %v2976_v32 = vpop.f32.mrb[15].mxu0 }
 0xc99   : > { %v2362_v33 = vadd.f32 %v2974_v28, %v2322_v31 }
 0xc9b   : > { %v2367_v34 = vadd.f32 %v2362_v33, %v4984_v56  ;;  %v2899_v56 = vld [vmem:[%s905_s17] ss:$0 sm:$0xff]  ;;  %s3796_s17 = sshll.u32 %s4002_s19, 4  ;;  %s3797_s17 = int_to_ptr.vmem [resolvable:$false] %s3796_s17 }
 0xc9c   : > { %s3798_s21 = scalar_lea.vmem %s3797_s17, 256  ;;  %p3799_p8 = scmp.lt.s32.totalorder %s5042_s10, %s3797_s17 }
 0xc9d   : > { %2370 = vadd.xlane.f32.xlu0 %v2367_v34  ;;  %p3800_p1 = scmp.lt.s32.totalorder %s3798_s21, %s3792_s30 }
 0xc9f   : > { %p3801_p13 = por %p3800_p1, %p3799_p8 }
 0xca1   : > { %p3802_p11 = pnand %p3801_p13, %p3795_p9 }
 0xd2a   : > { %v2371_v35 = vpop.xlane.xlu0 %2370 }
 0xd2b   : > { %v2372_v36 = vmul.f32 0.0078125, %v2371_v35 }
 0xd2d   : > { %v2373_v38 = vsub.f32 %v2367_v34, %v2372_v36 }
 0xd2f   : > { %v2374_v39 = vmul.f32 %v2373_v38, %v2373_v38 }
 0xd31   : > { %2375 = vadd.xlane.f32.xlu0 %v2374_v39 }
 0xdbe   : > { %v2376_v40 = vpop.xlane.xlu0 %2375 }
 0xdbf   : > { %v2377_v41 = vmul.f32 0.0078125, %v2376_v40 }
 0xdc1   : > { %v2378_v42 = vadd.f32 1e-05, %v2377_v41 }
 0xdc3   : > { %3342 = vrsqrt.f32 %v2378_v42 }
 0xdcd   : > { %v3343_v45 = vpop.eup %3342 }
 0xdce   : > { %v2380_v44 = vmul.f32 %v3343_v45, %v2373_v38 }
 0xdd0   : > { %v2387_v48 = vmul.f32 %v2898_v47, %v2380_v44 }
 0xdd2   : > { %v2394_v49 = vadd.f32 %v2899_v56, %v2387_v48 }
 0xdd4   : > { %2395 = vst [vmem:[%s4837_s27] sm:$0xff] %v2394_v49 }
 0xdd5   : > { %3805 = shalt.err (!%p3802_p11)
}
 0xdd6   : > { %s3806_s6 = scalar_lea.hbm %s5040_s28, 128  ;;  %s3810_s3 = scalar_lea.hbm %s5234_s18, 256 }
 0xdd7   : > { %p3807_p3 = scmp.ne.s32.totalorder %s5040_s28, %s3806_s6  ;;  %p3811_p2 = scmp.lt.u32.totalorder %s5040_s28, %s5234_s18 }
 0xdd8   : > { %p3812_p4 = scmp.lt.u32.totalorder %s3810_s3, %s3806_s6  ;;  %p3814_p5 = scmp.lt.u32.totalorder %s3806_s6, %s5040_s28 }
 0xdd9   : > { %p3808_p12 = pnand %p3807_p3, %p5235_p10 }
 0xdda   : > { %p3813_p6 = por %p3812_p4, %p3811_p2 }
 0xddb   : > { %p3809_p0 = pneg %p3808_p12 }
 0xddc   : > { %p3815_p7 = por %p3814_p5, %p3813_p6 }
 0xdde   : > { %p3816_p9 = pnand %p3815_p7, %p3809_p0 }
 0xde0   : > { %3819 = shalt.err (!%p3816_p9)
}
 0xde1   : > { %3084 = dma.vmem_to_hbm [thread:$0]  (%p5235_p10), %s5042_s10, 128, %s5040_s28, %s2397_s5  }
 0xde2 PF: > { %s5236_s20 = sld [smem:[#allocation42_spill]]  ;;  %s5237_s2 = sld [smem:[#allocation53_spill]] }
 0xde3   : > { %p3101_p8 = scmp.ge.s32.totalorder %s3974_s0, 2 }
 0xde8   : > { %s2422_s24 = sand.u32 1, %s5236_s20   ;;  %p5238_p1 = scmp.ne.s32.totalorder %s5237_s2, 0 }
 0xde9   : > { %s2423_s30 = scalar_lea.sflag [#allocation5], %s2422_s24 }
 0xdea   : > { %p3094_p13 = pnand %p3101_p8, %p5238_p1 }
 0xdec   : > { %3929 = dma.done.wait (!%p3094_p13), %s2423_s30, 128  }
 0xded   : > { %3931 = vsyncadd (!%p3094_p13), %s2423_s30, 4294967168  ;;  %s36_s0 = sadd.s32 1, %s3974_s0   ;;  %s5239_s21 = sld [smem:[#allocation41_spill]] }
 0xdee   : > { %p33_p11 = scmp.ge.s32.totalorder %s36_s0, 6   ;;  %s5240_s1 = sld [smem:[#allocation49_spill]] }
 0xdef   : > { %s5241_s10 = sld [smem:[#allocation50_spill]]  ;;  %s5242_s28 = sld [smem:[#allocation45_spill]] }
 0xdf0   : > { %s5243_s5 = sld [smem:[#allocation46_spill]]  ;;  %s5244_s30 = sld [smem:[#allocation47_spill]] }
 0xdf1   : > { %s5245_s22 = smov %s3942_s23  ;;  %s5247_s24 = smov %s3950_s25 }
 0xdf2   : > { %s5248_s25 = smov %s3954_s26  ;;  %s5250_s27 = smov %s3966_s29 }
 0xdf3   :  { %35 = sbr.rel (!%p33_p11) target bundleno = 27 (0x1b), region = 286 }
 0xdf4   : > { %s5246_s23 = smov %s5240_s1 }
 0xdf5   : > { %s5249_s26 = smov %s5241_s10 }
 0xdf6   : > { %s5251_s29 = smov %s5243_s5 }
 0xdfa   :  { %2428 = vsyncpa [#allocation4], 1 }
 0xdfb   :  { %2430 = vsyncpa [#allocation4 + $0x1], 1 }
 0xdfc   :  { %2431 = vsyncpa [#allocation7], 1 }
 0xdfd   :  { %2433 = vsyncpa [#allocation7 + $0x1], 1 }
 0xdfe   :  { %2434 = vsyncpa [#allocation10], 1 }
 0xdff   :  { %2435 = vsyncpa [#allocation5], 1 }
 0xe00   :  { %2437 = vsyncpa [#allocation5 + $0x1], 1 }

</bundles_post_ra>
